<compile_context>
chip_gen: v5e
topology: v5e:2x2
jax: 0.10.0
libtpu: 0.0.40
codegen_flags: <defaults>
</compile_context>

<pallas_src>
import math

import jax
import jax.numpy as jnp
from jax.experimental import pallas as pl
from jax.experimental.pallas import tpu as pltpu


LANE = 128  # pad with one full lane tile so the in-kernel concat stays tile-aligned


def _conv_bn(h, w_ref, scale, shift, *, relu):
    """1-D same-convolution as K shifted MXU matmuls, fused with folded BN (+ReLU).

    h:      (C_in, L) f32 value
    w_ref:  (K, C_out, C_in) VMEM ref, tap-major
    scale:  (C_out, 1) folded BN scale
    shift:  (C_out, 1) folded BN shift (includes the conv bias)
    """
    K, c_out, _ = w_ref.shape
    c_in, L = h.shape
    pad = (K - 1) // 2
    z = jnp.zeros((c_in, LANE), dtype=h.dtype)
    hp = jnp.concatenate([z, h, z], axis=1)          # (C_in, L + 2*LANE), aligned concat
    acc = jnp.zeros((c_out, L), dtype=jnp.float32)
    for k in range(K):                                # static unroll over taps
        off = LANE + k - pad                          # static lane offset
        acc = acc + jnp.dot(w_ref[k], hp[:, off:off + L],
                            preferred_element_type=jnp.float32)
    out = acc * scale + shift
    return jnp.maximum(out, 0.0) if relu else out


def resnet_block_kernel(x_ref, wx_ref, wy_ref, wz_ref, ws_ref,
                        sc_ref, sh_ref, o_ref):
    x = x_ref[...]                                                 # (C_in, L)
    h = _conv_bn(x, wx_ref, sc_ref[0], sh_ref[0], relu=True)       # conv7 + bn_x + relu
    h = _conv_bn(h, wy_ref, sc_ref[1], sh_ref[1], relu=True)       # conv5 + bn_y + relu
    h = _conv_bn(h, wz_ref, sc_ref[2], sh_ref[2], relu=False)      # conv3 + bn_z
    # Shortcut: 1x1 conv (identity matrix when in_ch == out_ch) + folded BN.
    short = jnp.dot(ws_ref[...], x, preferred_element_type=jnp.float32)
    short = short * sc_ref[3] + sh_ref[3]
    o_ref[...] = jnp.maximum(h + short, 0.0)


def resnet_block_forward(x, params, eps=1e-5):
    """x: (B, C_in, L) f32. Returns (B, C_out, L) f32."""
    B, C_in, L = x.shape
    C_out = params["wx"].shape[0]
    expand = C_in < C_out

    def fold(conv_bias, bn_stats):
        gamma, beta, mean, var = bn_stats
        s = gamma / jnp.sqrt(var + eps)
        return s, (conv_bias - mean) * s + beta

    sx, bx = fold(params["bx"], params["bn_x"])
    sy, by = fold(params["by"], params["bn_y"])
    sz, bz = fold(params["bz"], params["bn_z"])
    if expand:
        ws = params["ws"][:, :, 0].astype(jnp.float32)          # (C_out, C_in)
        ss, bs = fold(params["bs"], params["bn_s"])
    else:
        ws = jnp.eye(C_out, dtype=jnp.float32)                  # pure-BN shortcut
        ss, bs = fold(jnp.zeros((C_out,), jnp.float32), params["bn_s"])

    scales = jnp.stack([sx, sy, sz, ss]).reshape(4, C_out, 1).astype(jnp.float32)
    shifts = jnp.stack([bx, by, bz, bs]).reshape(4, C_out, 1).astype(jnp.float32)

    # Tap-major weights: (K, C_out, C_in_stage)
    wx = jnp.transpose(params["wx"], (2, 0, 1)).astype(jnp.float32)
    wy = jnp.transpose(params["wy"], (2, 0, 1)).astype(jnp.float32)
    wz = jnp.transpose(params["wz"], (2, 0, 1)).astype(jnp.float32)

    return pl.pallas_call(
        resnet_block_kernel,
        out_shape=jax.ShapeDtypeStruct((B, C_out, L), jnp.float32),
        grid_spec=pltpu.PrefetchScalarGridSpec(
            num_scalar_prefetch=0,
            grid=(B,),
            in_specs=[
                pl.BlockSpec((None, C_in, L), lambda b: (b, 0, 0)),       # x (per batch)
                pl.BlockSpec((7, C_out, C_in), lambda b: (0, 0, 0)),      # conv_x weight
                pl.BlockSpec((5, C_out, C_out), lambda b: (0, 0, 0)),     # conv_y weight
                pl.BlockSpec((3, C_out, C_out), lambda b: (0, 0, 0)),     # conv_z weight
                pl.BlockSpec((C_out, C_in), lambda b: (0, 0)),            # shortcut 1x1
                pl.BlockSpec((4, C_out, 1), lambda b: (0, 0, 0)),         # folded BN scales
                pl.BlockSpec((4, C_out, 1), lambda b: (0, 0, 0)),         # folded BN shifts
            ],
            out_specs=pl.BlockSpec((None, C_out, L), lambda b: (b, 0, 0)),
        ),
        compiler_params=pltpu.CompilerParams(
            dimension_semantics=("parallel",),   # v7x: split batch across 2 TCs
        ),
    )(x.astype(jnp.float32), wx, wy, wz, ws, scales, shifts)


if __name__ == "__main__":
    # Small shapes consistent with the module (in_channels < out_channels -> expand path).
    B, C_IN, C_OUT, L = 2, 32, 64, 128

    key = jax.random.PRNGKey(0)
    keys = jax.random.split(key, 9)

    def conv_init(kk, c_out, c_in, ksz):
        kw, kb = jax.random.split(kk)
        stdv = 1.0 / math.sqrt(c_in * ksz)
        w = jax.random.uniform(kw, (c_out, c_in, ksz), jnp.float32, -stdv, stdv)
        b = jax.random.uniform(kb, (c_out,), jnp.float32, -stdv, stdv)
        return w, b

    def bn_init(kk, c):
        k1, k2, k3, k4 = jax.random.split(kk, 4)
        gamma = jax.random.uniform(k1, (c,), jnp.float32, 0.5, 1.5)
        beta = jax.random.uniform(k2, (c,), jnp.float32, -0.5, 0.5)
        mean = 0.1 * jax.random.normal(k3, (c,), jnp.float32)
        var = jax.random.uniform(k4, (c,), jnp.float32, 0.5, 1.5)
        return gamma, beta, mean, var

    wx, bx = conv_init(keys[0], C_OUT, C_IN, 7)
    wy, by = conv_init(keys[1], C_OUT, C_OUT, 5)
    wz, bz = conv_init(keys[2], C_OUT, C_OUT, 3)
    ws, bs = conv_init(keys[3], C_OUT, C_IN, 1)
    bn_x = bn_init(keys[4], C_OUT)
    bn_y = bn_init(keys[5], C_OUT)
    bn_z = bn_init(keys[6], C_OUT)
    bn_s = bn_init(keys[7], C_OUT)

    params = dict(wx=wx, bx=bx, wy=wy, by=by, wz=wz, bz=bz, ws=ws, bs=bs,
                  bn_x=bn_x, bn_y=bn_y, bn_z=bn_z, bn_s=bn_s)

    x = jax.random.normal(keys[8], (B, C_IN, L), jnp.float32)

    out = jax.block_until_ready(resnet_block_forward(x, params))

    # Plain-JAX reference (eval-mode BN), mirroring the PyTorch forward.
    def conv1d(h, w, b, pad):
        y = jax.lax.conv_general_dilated(
            h, w, window_strides=(1,), padding=[(pad, pad)],
            dimension_numbers=("NCH", "OIH", "NCH"))
        return y + b[None, :, None]

    def bn(h, stats):
        gamma, beta, mean, var = stats
        return ((h - mean[None, :, None]) / jnp.sqrt(var[None, :, None] + 1e-5)
                * gamma[None, :, None] + beta[None, :, None])

    h = jax.nn.relu(bn(conv1d(x, wx, bx, 3), bn_x))
    h = jax.nn.relu(bn(conv1d(h, wy, by, 2), bn_y))
    h = bn(conv1d(h, wz, bz, 1), bn_z)
    sc = bn(conv1d(x, ws, bs, 0), bn_s)          # expand=True -> 1x1 conv shortcut
    ref = jax.nn.relu(h + sc)

    assert out.shape == (B, C_OUT, L)
    assert jnp.allclose(out, ref, atol=1e-3, rtol=1e-3), \
        float(jnp.max(jnp.abs(out - ref)))

    print("KERNEL_OK")
</pallas_src>

<mosaic_0001>
module attributes {stable_mosaic.version = 11 : i64} {
  func.func @resnet_block_kernel(%arg0: i32, %arg1: memref<1x32x128xf32, #tpu.memory_space<vmem>>, %arg2: memref<7x64x32xf32, #tpu.memory_space<vmem>>, %arg3: memref<5x64x64xf32, #tpu.memory_space<vmem>>, %arg4: memref<3x64x64xf32, #tpu.memory_space<vmem>>, %arg5: memref<64x32xf32, #tpu.memory_space<vmem>>, %arg6: memref<4x64x1xf32, #tpu.memory_space<vmem>>, %arg7: memref<4x64x1xf32, #tpu.memory_space<vmem>>, %arg8: memref<1x64x128xf32, #tpu.memory_space<vmem>>) attributes {dimension_semantics = [#tpu.dimension_semantics<parallel>], iteration_bounds = array<i64: 2>, scalar_prefetch = 0 : i64, scratch_operands = 0 : i64, tpu.core_type = #tpu.core_type<tc>, window_params = [{transform_indices = @transform_0, window_bounds = array<i64: 1, 32, 128>}, {pipeline_mode = #tpu.pipeline_mode<synchronous>, transform_indices = @transform_1, window_bounds = array<i64: 7, 64, 32>}, {pipeline_mode = #tpu.pipeline_mode<synchronous>, transform_indices = @transform_2, window_bounds = array<i64: 5, 64, 64>}, {pipeline_mode = #tpu.pipeline_mode<synchronous>, transform_indices = @transform_3, window_bounds = array<i64: 3, 64, 64>}, {pipeline_mode = #tpu.pipeline_mode<synchronous>, transform_indices = @transform_4, window_bounds = array<i64: 64, 32>}, {pipeline_mode = #tpu.pipeline_mode<synchronous>, transform_indices = @transform_5, window_bounds = array<i64: 4, 64, 1>}, {pipeline_mode = #tpu.pipeline_mode<synchronous>, transform_indices = @transform_6, window_bounds = array<i64: 4, 64, 1>}, {transform_indices = @transform_7, window_bounds = array<i64: 1, 64, 128>}]} {
    %c0 = arith.constant 0 : index
    %c0_0 = arith.constant 0 : index
    %c0_1 = arith.constant 0 : index
    %0 = vector.load %arg1[%c0, %c0_0, %c0_1] : memref<1x32x128xf32, #tpu.memory_space<vmem>>, vector<1x32x128xf32>
    %1 = vector.shape_cast %0 : vector<1x32x128xf32> to vector<32x128xf32>
    %c0_2 = arith.constant 0 : index
    %c0_3 = arith.constant 0 : index
    %c0_4 = arith.constant 0 : index
    %2 = vector.load %arg6[%c0_2, %c0_3, %c0_4] : memref<4x64x1xf32, #tpu.memory_space<vmem>>, vector<1x64x1xf32>
    %3 = vector.shape_cast %2 : vector<1x64x1xf32> to vector<64x1xf32>
    %c0_5 = arith.constant 0 : index
    %c0_6 = arith.constant 0 : index
    %c0_7 = arith.constant 0 : index
    %4 = vector.load %arg7[%c0_5, %c0_6, %c0_7] : memref<4x64x1xf32, #tpu.memory_space<vmem>>, vector<1x64x1xf32>
    %5 = vector.shape_cast %4 : vector<1x64x1xf32> to vector<64x1xf32>
    %cst = arith.constant 0.000000e+00 : f32
    %6 = vector.broadcast %cst : f32 to vector<32x128xf32>
    %7 = tpu.concatenate %6, %1, %6 in 1 : vector<32x128xf32>, vector<32x128xf32>, vector<32x128xf32> -> vector<32x384xf32>
    %cst_8 = arith.constant 0.000000e+00 : f32
    %8 = vector.broadcast %cst_8 : f32 to vector<64x128xf32>
    %c0_9 = arith.constant 0 : index
    %c0_10 = arith.constant 0 : index
    %c0_11 = arith.constant 0 : index
    %9 = vector.load %arg2[%c0_9, %c0_10, %c0_11] : memref<7x64x32xf32, #tpu.memory_space<vmem>>, vector<1x64x32xf32>
    %10 = vector.shape_cast %9 : vector<1x64x32xf32> to vector<64x32xf32>
    %11 = vector.extract_strided_slice %7 {offsets = [0, 125], sizes = [32, 128], strides = [1, 1]} : vector<32x384xf32> to vector<32x128xf32>
    %cst_12 = arith.constant dense<0.000000e+00> : vector<64x128xf32>
    %12 = tpu.matmul %10, %11, %cst_12 {dimension_numbers = #tpu.dot_dimension_numbers<[1], [0], [0], [1], [0, 0, 1, 1], [], []>} : vector<64x32xf32>, vector<32x128xf32>, vector<64x128xf32> -> vector<64x128xf32>
    %13 = arith.addf %8, %12 : vector<64x128xf32>
    %c1 = arith.constant 1 : index
    %c0_13 = arith.constant 0 : index
    %c0_14 = arith.constant 0 : index
    %14 = vector.load %arg2[%c1, %c0_13, %c0_14] : memref<7x64x32xf32, #tpu.memory_space<vmem>>, vector<1x64x32xf32>
    %15 = vector.shape_cast %14 : vector<1x64x32xf32> to vector<64x32xf32>
    %16 = vector.extract_strided_slice %7 {offsets = [0, 126], sizes = [32, 128], strides = [1, 1]} : vector<32x384xf32> to vector<32x128xf32>
    %cst_15 = arith.constant dense<0.000000e+00> : vector<64x128xf32>
    %17 = tpu.matmul %15, %16, %cst_15 {dimension_numbers = #tpu.dot_dimension_numbers<[1], [0], [0], [1], [0, 0, 1, 1], [], []>} : vector<64x32xf32>, vector<32x128xf32>, vector<64x128xf32> -> vector<64x128xf32>
    %18 = arith.addf %13, %17 : vector<64x128xf32>
    %c2 = arith.constant 2 : index
    %c0_16 = arith.constant 0 : index
    %c0_17 = arith.constant 0 : index
    %19 = vector.load %arg2[%c2, %c0_16, %c0_17] : memref<7x64x32xf32, #tpu.memory_space<vmem>>, vector<1x64x32xf32>
    %20 = vector.shape_cast %19 : vector<1x64x32xf32> to vector<64x32xf32>
    %21 = vector.extract_strided_slice %7 {offsets = [0, 127], sizes = [32, 128], strides = [1, 1]} : vector<32x384xf32> to vector<32x128xf32>
    %cst_18 = arith.constant dense<0.000000e+00> : vector<64x128xf32>
    %22 = tpu.matmul %20, %21, %cst_18 {dimension_numbers = #tpu.dot_dimension_numbers<[1], [0], [0], [1], [0, 0, 1, 1], [], []>} : vector<64x32xf32>, vector<32x128xf32>, vector<64x128xf32> -> vector<64x128xf32>
    %23 = arith.addf %18, %22 : vector<64x128xf32>
    %c3 = arith.constant 3 : index
    %c0_19 = arith.constant 0 : index
    %c0_20 = arith.constant 0 : index
    %24 = vector.load %arg2[%c3, %c0_19, %c0_20] : memref<7x64x32xf32, #tpu.memory_space<vmem>>, vector<1x64x32xf32>
    %25 = vector.shape_cast %24 : vector<1x64x32xf32> to vector<64x32xf32>
    %26 = vector.extract_strided_slice %7 {offsets = [0, 128], sizes = [32, 128], strides = [1, 1]} : vector<32x384xf32> to vector<32x128xf32>
    %cst_21 = arith.constant dense<0.000000e+00> : vector<64x128xf32>
    %27 = tpu.matmul %25, %26, %cst_21 {dimension_numbers = #tpu.dot_dimension_numbers<[1], [0], [0], [1], [0, 0, 1, 1], [], []>} : vector<64x32xf32>, vector<32x128xf32>, vector<64x128xf32> -> vector<64x128xf32>
    %28 = arith.addf %23, %27 : vector<64x128xf32>
    %c4 = arith.constant 4 : index
    %c0_22 = arith.constant 0 : index
    %c0_23 = arith.constant 0 : index
    %29 = vector.load %arg2[%c4, %c0_22, %c0_23] : memref<7x64x32xf32, #tpu.memory_space<vmem>>, vector<1x64x32xf32>
    %30 = vector.shape_cast %29 : vector<1x64x32xf32> to vector<64x32xf32>
    %31 = vector.extract_strided_slice %7 {offsets = [0, 129], sizes = [32, 128], strides = [1, 1]} : vector<32x384xf32> to vector<32x128xf32>
    %cst_24 = arith.constant dense<0.000000e+00> : vector<64x128xf32>
    %32 = tpu.matmul %30, %31, %cst_24 {dimension_numbers = #tpu.dot_dimension_numbers<[1], [0], [0], [1], [0, 0, 1, 1], [], []>} : vector<64x32xf32>, vector<32x128xf32>, vector<64x128xf32> -> vector<64x128xf32>
    %33 = arith.addf %28, %32 : vector<64x128xf32>
    %c5 = arith.constant 5 : index
    %c0_25 = arith.constant 0 : index
    %c0_26 = arith.constant 0 : index
    %34 = vector.load %arg2[%c5, %c0_25, %c0_26] : memref<7x64x32xf32, #tpu.memory_space<vmem>>, vector<1x64x32xf32>
    %35 = vector.shape_cast %34 : vector<1x64x32xf32> to vector<64x32xf32>
    %36 = vector.extract_strided_slice %7 {offsets = [0, 130], sizes = [32, 128], strides = [1, 1]} : vector<32x384xf32> to vector<32x128xf32>
    %cst_27 = arith.constant dense<0.000000e+00> : vector<64x128xf32>
    %37 = tpu.matmul %35, %36, %cst_27 {dimension_numbers = #tpu.dot_dimension_numbers<[1], [0], [0], [1], [0, 0, 1, 1], [], []>} : vector<64x32xf32>, vector<32x128xf32>, vector<64x128xf32> -> vector<64x128xf32>
    %38 = arith.addf %33, %37 : vector<64x128xf32>
    %c6 = arith.constant 6 : index
    %c0_28 = arith.constant 0 : index
    %c0_29 = arith.constant 0 : index
    %39 = vector.load %arg2[%c6, %c0_28, %c0_29] : memref<7x64x32xf32, #tpu.memory_space<vmem>>, vector<1x64x32xf32>
    %40 = vector.shape_cast %39 : vector<1x64x32xf32> to vector<64x32xf32>
    %41 = vector.extract_strided_slice %7 {offsets = [0, 131], sizes = [32, 128], strides = [1, 1]} : vector<32x384xf32> to vector<32x128xf32>
    %cst_30 = arith.constant dense<0.000000e+00> : vector<64x128xf32>
    %42 = tpu.matmul %40, %41, %cst_30 {dimension_numbers = #tpu.dot_dimension_numbers<[1], [0], [0], [1], [0, 0, 1, 1], [], []>} : vector<64x32xf32>, vector<32x128xf32>, vector<64x128xf32> -> vector<64x128xf32>
    %43 = arith.addf %38, %42 : vector<64x128xf32>
    %44 = vector.broadcast %3 : vector<64x1xf32> to vector<64x128xf32>
    %45 = arith.mulf %43, %44 : vector<64x128xf32>
    %46 = vector.broadcast %5 : vector<64x1xf32> to vector<64x128xf32>
    %47 = arith.addf %45, %46 : vector<64x128xf32>
    %cst_31 = arith.constant 0.000000e+00 : f32
    %48 = vector.broadcast %cst_31 : f32 to vector<64x128xf32>
    %49 = arith.maximumf %47, %48 : vector<64x128xf32>
    %c1_32 = arith.constant 1 : index
    %c0_33 = arith.constant 0 : index
    %c0_34 = arith.constant 0 : index
    %50 = vector.load %arg6[%c1_32, %c0_33, %c0_34] : memref<4x64x1xf32, #tpu.memory_space<vmem>>, vector<1x64x1xf32>
    %51 = vector.shape_cast %50 : vector<1x64x1xf32> to vector<64x1xf32>
    %c1_35 = arith.constant 1 : index
    %c0_36 = arith.constant 0 : index
    %c0_37 = arith.constant 0 : index
    %52 = vector.load %arg7[%c1_35, %c0_36, %c0_37] : memref<4x64x1xf32, #tpu.memory_space<vmem>>, vector<1x64x1xf32>
    %53 = vector.shape_cast %52 : vector<1x64x1xf32> to vector<64x1xf32>
    %cst_38 = arith.constant 0.000000e+00 : f32
    %54 = vector.broadcast %cst_38 : f32 to vector<64x128xf32>
    %55 = tpu.concatenate %54, %49, %54 in 1 : vector<64x128xf32>, vector<64x128xf32>, vector<64x128xf32> -> vector<64x384xf32>
    %cst_39 = arith.constant 0.000000e+00 : f32
    %56 = vector.broadcast %cst_39 : f32 to vector<64x128xf32>
    %c0_40 = arith.constant 0 : index
    %c0_41 = arith.constant 0 : index
    %c0_42 = arith.constant 0 : index
    %57 = vector.load %arg3[%c0_40, %c0_41, %c0_42] : memref<5x64x64xf32, #tpu.memory_space<vmem>>, vector<1x64x64xf32>
    %58 = vector.shape_cast %57 : vector<1x64x64xf32> to vector<64x64xf32>
    %59 = vector.extract_strided_slice %55 {offsets = [0, 126], sizes = [64, 128], strides = [1, 1]} : vector<64x384xf32> to vector<64x128xf32>
    %cst_43 = arith.constant dense<0.000000e+00> : vector<64x128xf32>
    %60 = tpu.matmul %58, %59, %cst_43 {dimension_numbers = #tpu.dot_dimension_numbers<[1], [0], [0], [1], [0, 0, 1, 1], [], []>} : vector<64x64xf32>, vector<64x128xf32>, vector<64x128xf32> -> vector<64x128xf32>
    %61 = arith.addf %56, %60 : vector<64x128xf32>
    %c1_44 = arith.constant 1 : index
    %c0_45 = arith.constant 0 : index
    %c0_46 = arith.constant 0 : index
    %62 = vector.load %arg3[%c1_44, %c0_45, %c0_46] : memref<5x64x64xf32, #tpu.memory_space<vmem>>, vector<1x64x64xf32>
    %63 = vector.shape_cast %62 : vector<1x64x64xf32> to vector<64x64xf32>
    %64 = vector.extract_strided_slice %55 {offsets = [0, 127], sizes = [64, 128], strides = [1, 1]} : vector<64x384xf32> to vector<64x128xf32>
    %cst_47 = arith.constant dense<0.000000e+00> : vector<64x128xf32>
    %65 = tpu.matmul %63, %64, %cst_47 {dimension_numbers = #tpu.dot_dimension_numbers<[1], [0], [0], [1], [0, 0, 1, 1], [], []>} : vector<64x64xf32>, vector<64x128xf32>, vector<64x128xf32> -> vector<64x128xf32>
    %66 = arith.addf %61, %65 : vector<64x128xf32>
    %c2_48 = arith.constant 2 : index
    %c0_49 = arith.constant 0 : index
    %c0_50 = arith.constant 0 : index
    %67 = vector.load %arg3[%c2_48, %c0_49, %c0_50] : memref<5x64x64xf32, #tpu.memory_space<vmem>>, vector<1x64x64xf32>
    %68 = vector.shape_cast %67 : vector<1x64x64xf32> to vector<64x64xf32>
    %69 = vector.extract_strided_slice %55 {offsets = [0, 128], sizes = [64, 128], strides = [1, 1]} : vector<64x384xf32> to vector<64x128xf32>
    %cst_51 = arith.constant dense<0.000000e+00> : vector<64x128xf32>
    %70 = tpu.matmul %68, %69, %cst_51 {dimension_numbers = #tpu.dot_dimension_numbers<[1], [0], [0], [1], [0, 0, 1, 1], [], []>} : vector<64x64xf32>, vector<64x128xf32>, vector<64x128xf32> -> vector<64x128xf32>
    %71 = arith.addf %66, %70 : vector<64x128xf32>
    %c3_52 = arith.constant 3 : index
    %c0_53 = arith.constant 0 : index
    %c0_54 = arith.constant 0 : index
    %72 = vector.load %arg3[%c3_52, %c0_53, %c0_54] : memref<5x64x64xf32, #tpu.memory_space<vmem>>, vector<1x64x64xf32>
    %73 = vector.shape_cast %72 : vector<1x64x64xf32> to vector<64x64xf32>
    %74 = vector.extract_strided_slice %55 {offsets = [0, 129], sizes = [64, 128], strides = [1, 1]} : vector<64x384xf32> to vector<64x128xf32>
    %cst_55 = arith.constant dense<0.000000e+00> : vector<64x128xf32>
    %75 = tpu.matmul %73, %74, %cst_55 {dimension_numbers = #tpu.dot_dimension_numbers<[1], [0], [0], [1], [0, 0, 1, 1], [], []>} : vector<64x64xf32>, vector<64x128xf32>, vector<64x128xf32> -> vector<64x128xf32>
    %76 = arith.addf %71, %75 : vector<64x128xf32>
    %c4_56 = arith.constant 4 : index
    %c0_57 = arith.constant 0 : index
    %c0_58 = arith.constant 0 : index
    %77 = vector.load %arg3[%c4_56, %c0_57, %c0_58] : memref<5x64x64xf32, #tpu.memory_space<vmem>>, vector<1x64x64xf32>
    %78 = vector.shape_cast %77 : vector<1x64x64xf32> to vector<64x64xf32>
    %79 = vector.extract_strided_slice %55 {offsets = [0, 130], sizes = [64, 128], strides = [1, 1]} : vector<64x384xf32> to vector<64x128xf32>
    %cst_59 = arith.constant dense<0.000000e+00> : vector<64x128xf32>
    %80 = tpu.matmul %78, %79, %cst_59 {dimension_numbers = #tpu.dot_dimension_numbers<[1], [0], [0], [1], [0, 0, 1, 1], [], []>} : vector<64x64xf32>, vector<64x128xf32>, vector<64x128xf32> -> vector<64x128xf32>
    %81 = arith.addf %76, %80 : vector<64x128xf32>
    %82 = vector.broadcast %51 : vector<64x1xf32> to vector<64x128xf32>
    %83 = arith.mulf %81, %82 : vector<64x128xf32>
    %84 = vector.broadcast %53 : vector<64x1xf32> to vector<64x128xf32>
    %85 = arith.addf %83, %84 : vector<64x128xf32>
    %cst_60 = arith.constant 0.000000e+00 : f32
    %86 = vector.broadcast %cst_60 : f32 to vector<64x128xf32>
    %87 = arith.maximumf %85, %86 : vector<64x128xf32>
    %c2_61 = arith.constant 2 : index
    %c0_62 = arith.constant 0 : index
    %c0_63 = arith.constant 0 : index
    %88 = vector.load %arg6[%c2_61, %c0_62, %c0_63] : memref<4x64x1xf32, #tpu.memory_space<vmem>>, vector<1x64x1xf32>
    %89 = vector.shape_cast %88 : vector<1x64x1xf32> to vector<64x1xf32>
    %c2_64 = arith.constant 2 : index
    %c0_65 = arith.constant 0 : index
    %c0_66 = arith.constant 0 : index
    %90 = vector.load %arg7[%c2_64, %c0_65, %c0_66] : memref<4x64x1xf32, #tpu.memory_space<vmem>>, vector<1x64x1xf32>
    %91 = vector.shape_cast %90 : vector<1x64x1xf32> to vector<64x1xf32>
    %cst_67 = arith.constant 0.000000e+00 : f32
    %92 = vector.broadcast %cst_67 : f32 to vector<64x128xf32>
    %93 = tpu.concatenate %92, %87, %92 in 1 : vector<64x128xf32>, vector<64x128xf32>, vector<64x128xf32> -> vector<64x384xf32>
    %cst_68 = arith.constant 0.000000e+00 : f32
    %94 = vector.broadcast %cst_68 : f32 to vector<64x128xf32>
    %c0_69 = arith.constant 0 : index
    %c0_70 = arith.constant 0 : index
    %c0_71 = arith.constant 0 : index
    %95 = vector.load %arg4[%c0_69, %c0_70, %c0_71] : memref<3x64x64xf32, #tpu.memory_space<vmem>>, vector<1x64x64xf32>
    %96 = vector.shape_cast %95 : vector<1x64x64xf32> to vector<64x64xf32>
    %97 = vector.extract_strided_slice %93 {offsets = [0, 127], sizes = [64, 128], strides = [1, 1]} : vector<64x384xf32> to vector<64x128xf32>
    %cst_72 = arith.constant dense<0.000000e+00> : vector<64x128xf32>
    %98 = tpu.matmul %96, %97, %cst_72 {dimension_numbers = #tpu.dot_dimension_numbers<[1], [0], [0], [1], [0, 0, 1, 1], [], []>} : vector<64x64xf32>, vector<64x128xf32>, vector<64x128xf32> -> vector<64x128xf32>
    %99 = arith.addf %94, %98 : vector<64x128xf32>
    %c1_73 = arith.constant 1 : index
    %c0_74 = arith.constant 0 : index
    %c0_75 = arith.constant 0 : index
    %100 = vector.load %arg4[%c1_73, %c0_74, %c0_75] : memref<3x64x64xf32, #tpu.memory_space<vmem>>, vector<1x64x64xf32>
    %101 = vector.shape_cast %100 : vector<1x64x64xf32> to vector<64x64xf32>
    %102 = vector.extract_strided_slice %93 {offsets = [0, 128], sizes = [64, 128], strides = [1, 1]} : vector<64x384xf32> to vector<64x128xf32>
    %cst_76 = arith.constant dense<0.000000e+00> : vector<64x128xf32>
    %103 = tpu.matmul %101, %102, %cst_76 {dimension_numbers = #tpu.dot_dimension_numbers<[1], [0], [0], [1], [0, 0, 1, 1], [], []>} : vector<64x64xf32>, vector<64x128xf32>, vector<64x128xf32> -> vector<64x128xf32>
    %104 = arith.addf %99, %103 : vector<64x128xf32>
    %c2_77 = arith.constant 2 : index
    %c0_78 = arith.constant 0 : index
    %c0_79 = arith.constant 0 : index
    %105 = vector.load %arg4[%c2_77, %c0_78, %c0_79] : memref<3x64x64xf32, #tpu.memory_space<vmem>>, vector<1x64x64xf32>
    %106 = vector.shape_cast %105 : vector<1x64x64xf32> to vector<64x64xf32>
    %107 = vector.extract_strided_slice %93 {offsets = [0, 129], sizes = [64, 128], strides = [1, 1]} : vector<64x384xf32> to vector<64x128xf32>
    %cst_80 = arith.constant dense<0.000000e+00> : vector<64x128xf32>
    %108 = tpu.matmul %106, %107, %cst_80 {dimension_numbers = #tpu.dot_dimension_numbers<[1], [0], [0], [1], [0, 0, 1, 1], [], []>} : vector<64x64xf32>, vector<64x128xf32>, vector<64x128xf32> -> vector<64x128xf32>
    %109 = arith.addf %104, %108 : vector<64x128xf32>
    %110 = vector.broadcast %89 : vector<64x1xf32> to vector<64x128xf32>
    %111 = arith.mulf %109, %110 : vector<64x128xf32>
    %112 = vector.broadcast %91 : vector<64x1xf32> to vector<64x128xf32>
    %113 = arith.addf %111, %112 : vector<64x128xf32>
    %c0_81 = arith.constant 0 : index
    %c0_82 = arith.constant 0 : index
    %114 = vector.load %arg5[%c0_81, %c0_82] : memref<64x32xf32, #tpu.memory_space<vmem>>, vector<64x32xf32>
    %cst_83 = arith.constant dense<0.000000e+00> : vector<64x128xf32>
    %115 = tpu.matmul %114, %1, %cst_83 {dimension_numbers = #tpu.dot_dimension_numbers<[1], [0], [0], [1], [0, 0, 1, 1], [], []>} : vector<64x32xf32>, vector<32x128xf32>, vector<64x128xf32> -> vector<64x128xf32>
    %c3_84 = arith.constant 3 : index
    %c0_85 = arith.constant 0 : index
    %c0_86 = arith.constant 0 : index
    %116 = vector.load %arg6[%c3_84, %c0_85, %c0_86] : memref<4x64x1xf32, #tpu.memory_space<vmem>>, vector<1x64x1xf32>
    %117 = vector.shape_cast %116 : vector<1x64x1xf32> to vector<64x1xf32>
    %118 = vector.broadcast %117 : vector<64x1xf32> to vector<64x128xf32>
    %119 = arith.mulf %115, %118 : vector<64x128xf32>
    %c3_87 = arith.constant 3 : index
    %c0_88 = arith.constant 0 : index
    %c0_89 = arith.constant 0 : index
    %120 = vector.load %arg7[%c3_87, %c0_88, %c0_89] : memref<4x64x1xf32, #tpu.memory_space<vmem>>, vector<1x64x1xf32>
    %121 = vector.shape_cast %120 : vector<1x64x1xf32> to vector<64x1xf32>
    %122 = vector.broadcast %121 : vector<64x1xf32> to vector<64x128xf32>
    %123 = arith.addf %119, %122 : vector<64x128xf32>
    %124 = arith.addf %113, %123 : vector<64x128xf32>
    %cst_90 = arith.constant 0.000000e+00 : f32
    %125 = vector.broadcast %cst_90 : f32 to vector<64x128xf32>
    %126 = arith.maximumf %124, %125 : vector<64x128xf32>
    %c0_91 = arith.constant 0 : index
    %c0_92 = arith.constant 0 : index
    %c0_93 = arith.constant 0 : index
    %127 = vector.load %arg8[%c0_91, %c0_92, %c0_93] : memref<1x64x128xf32, #tpu.memory_space<vmem>>, vector<1x64x128xf32>
    %128 = vector.shape_cast %127 : vector<1x64x128xf32> to vector<64x128xf32>
    %129 = vector.shape_cast %126 : vector<64x128xf32> to vector<1x64x128xf32>
    tpu.vector_store %arg8[%c0_91, %c0_92, %c0_93], %129 {strides = array<i32>} : memref<1x64x128xf32, #tpu.memory_space<vmem>>, vector<1x64x128xf32>,
    return
  }
  func.func @transform_0(%arg0: i32) -> (i32, i32, i32) {
    %c0_i32 = arith.constant 0 : i32
    %c0_i32_0 = arith.constant 0 : i32
    %c0_i32_1 = arith.constant 0 : i32
    return %arg0, %c0_i32, %c0_i32_0 : i32, i32, i32
  }
  func.func @transform_1(%arg0: i32) -> (i32, i32, i32) {
    %c0_i32 = arith.constant 0 : i32
    %c0_i32_0 = arith.constant 0 : i32
    %c0_i32_1 = arith.constant 0 : i32
    %c0_i32_2 = arith.constant 0 : i32
    return %c0_i32, %c0_i32_0, %c0_i32_1 : i32, i32, i32
  }
  func.func @transform_2(%arg0: i32) -> (i32, i32, i32) {
    %c0_i32 = arith.constant 0 : i32
    %c0_i32_0 = arith.constant 0 : i32
    %c0_i32_1 = arith.constant 0 : i32
    %c0_i32_2 = arith.constant 0 : i32
    return %c0_i32, %c0_i32_0, %c0_i32_1 : i32, i32, i32
  }
  func.func @transform_3(%arg0: i32) -> (i32, i32, i32) {
    %c0_i32 = arith.constant 0 : i32
    %c0_i32_0 = arith.constant 0 : i32
    %c0_i32_1 = arith.constant 0 : i32
    %c0_i32_2 = arith.constant 0 : i32
    return %c0_i32, %c0_i32_0, %c0_i32_1 : i32, i32, i32
  }
  func.func @transform_4(%arg0: i32) -> (i32, i32) {
    %c0_i32 = arith.constant 0 : i32
    %c0_i32_0 = arith.constant 0 : i32
    %c0_i32_1 = arith.constant 0 : i32
    return %c0_i32, %c0_i32_0 : i32, i32
  }
  func.func @transform_5(%arg0: i32) -> (i32, i32, i32) {
    %c0_i32 = arith.constant 0 : i32
    %c0_i32_0 = arith.constant 0 : i32
    %c0_i32_1 = arith.constant 0 : i32
    %c0_i32_2 = arith.constant 0 : i32
    return %c0_i32, %c0_i32_0, %c0_i32_1 : i32, i32, i32
  }
  func.func @transform_6(%arg0: i32) -> (i32, i32, i32) {
    %c0_i32 = arith.constant 0 : i32
    %c0_i32_0 = arith.constant 0 : i32
    %c0_i32_1 = arith.constant 0 : i32
    %c0_i32_2 = arith.constant 0 : i32
    return %c0_i32, %c0_i32_0, %c0_i32_1 : i32, i32, i32
  }
  func.func @transform_7(%arg0: i32) -> (i32, i32, i32) {
    %c0_i32 = arith.constant 0 : i32
    %c0_i32_0 = arith.constant 0 : i32
    %c0_i32_1 = arith.constant 0 : i32
    return %arg0, %c0_i32, %c0_i32_0 : i32, i32, i32
  }
}

</mosaic_0001>

<bundles_post_ra>
// kernel: tpu_custom_call.1
= control target key start
LH: loop header
LB: loop body
LE: loop exit
PB: predicated region body
PF: predicated region fallthrough
CT: control target
= control target key end

     0   :  { %12 = vsyncpa [#allocation3], 0  ;;  %s4254_s0 = inlined_call_operand.vmem [shape: f32[2,32,128], index: 0, kind: input, shape index: {}]   ;;  %s4255_s1 = inlined_call_operand.vmem [shape: f32[7,64,32], index: 1, kind: input, shape index: {}]   ;;  %s4256_s2 = inlined_call_operand.vmem [shape: f32[5,64,64], index: 2, kind: input, shape index: {}]   ;;  %s4257_s3 = inlined_call_operand.vmem [shape: f32[3,64,64], index: 3, kind: input, shape index: {}]   ;;  %s4258_s4 = inlined_call_operand.vmem [shape: f32[64,32], index: 4, kind: input, shape index: {}]   ;;  %s4259_s5 = inlined_call_operand.vmem [shape: f32[4,64,1], index: 5, kind: input, shape index: {}]   ;;  %s4260_s6 = inlined_call_operand.vmem [shape: f32[4,64,1], index: 6, kind: input, shape index: {}]   ;;  %s4261_s7 = inlined_call_operand.hbm [shape: f32[2,64,128], index: 7, kind: output, shape index: {}]  }
   0x1   :  { %14 = vsyncpa [#allocation3 + $0x1], 0  ;;  %s3070_s24 = smov 0   ;;  %s3072_s25 = smov 0  }
   0x2   :  { %s3074_s26 = smov 0   ;;  %s3076_s27 = smov 0  }
   0x3 LB: > { %s3091_s28 = sadd.s32 4294967295, %s3018_s27   ;;  %s2434_s29 = sadd.s32 4294967294, %s3018_s27   ;;  %s3018_s27 = sphi %s3076_s27, %s4270_s27   ;;  %s3014_s26 = sphi %s3074_s26, %s4269_s26   ;;  %s3010_s25 = sphi %s3072_s25, %s4268_s25   ;;  %s3006_s24 = sphi %s3070_s24, %s4267_s24  }
   0x4   : > { %s3095_s30 = sadd.s32 1, %s3018_s27   ;;  %s179_s8 = sadd.s32 1, %s3014_s26 }
   0x5   : > { %s176_s9 = ssub.s32 %s3018_s27, %s3095_s30  ;;  %p189_p0 = scmp.ne.s32.totalorder %s3014_s26, %s3010_s25 }
   0x6   : > { %p177_p1 = scmp.eq.s32.totalorder %s176_s9, 0  ;;  %p190_p2 = scmp.eq.s32.totalorder %s3091_s28, 1 }
   0x7   : > { %p195_p3 = scmp.ne.s32.totalorder %s3010_s25, %s3006_s24  ;;  %p196_p4 = scmp.eq.s32.totalorder %s2434_s29, 1 }
   0x8   : > { %s3106_s10 = scalar_select %p177_p1, %s3014_s26, %s179_s8  }
   0x9   : > { %p3108_p5 = por %p190_p2, %p189_p0  ;;  %p3112_p6 = por %p196_p4, %p195_p3 }
   0xa   : > { %p2437_p7 = scmp.ge.s32.totalorder %s3018_s27, 1  ;;  %p240_p8 = scmp.lt.s32.totalorder %s3018_s27, 3 }
   0xc   : > { %p241_p9 = pnand %p2437_p7, %p240_p8 }
   0xd   : > { %p272_p10 = scmp.lt.s32.totalorder (!%p241_p9), %s3091_s28, 1  ;;  %s3021_s18 = smov (!%p241_p9), 1  }
   0xe   : > { %244 = sbr.rel (%p241_p9) target bundleno = 1137 (0x471), region = 48  ;;  %s3022_s19 = smov (!%p241_p9), 3  }
   0xf   : > { %s3023_s20 = smov (!%p241_p9), 2   ;;  %s3024_s21 = smov (!%p241_p9), 127  }
  0x10   : > { %s3025_s22 = smov (!%p241_p9), 125   ;;  %s4262_s23 = smov (!%p241_p9), 126  }
  0x11   : > { %s4266_s29 = smov (!%p241_p9), 126  }
  0x13   : > { %s273_s13 = scalar_select %p272_p10, %s3091_s28, 1  ;;  %v3020_v3 = vmov 0.0   ;;  %vm414_vm0 = vcmask 23552   ;;  %vm338_vm1 = vcmask 261120   ;;  %v2481_v14 = vld [vmem:[%s4255_s1 + $0xc0] sm:$0xff]  ;;  %v2482_v20 = vld [vmem:[%s4255_s1 + $0xc8] sm:$0xff] }
  0x14   : > { %v297_v18 = vld [vmem:[%s4255_s1] sm:$0xff]  ;;  %vm507_vm2 = vcmask 7168   ;;  %v298_v26 = vld [vmem:[%s4255_s1 + $0x8] sm:$0xff]  ;;  %v2483_v29 = vld [vmem:[%s4255_s1 + $0xd0] sm:$0xff]  ;;  %vm329_vm3 = vcmask 15360   ;;  %vm690_vm4 = vcmask 1039360  }
  0x15   : > { %s2718_s14 = sshll.u32 %s273_s13, 5  ;;  %v299_v37 = vld [vmem:[%s4255_s1 + $0x10] sm:$0xff]  ;;  %v2484_v40 = vld [vmem:[%s4255_s1 + $0xd8] sm:$0xff]  ;;  %v2441_v45 = vld [vmem:[%s4255_s1 + $0x40] sm:$0xff]  ;;  %vm892_vm5 = vcmask 1022976   ;;  %vm791_vm6 = vcmask 1031168  }
  0x16   : > { %s3123_s17 = scalar_lea.vmem %s4254_s0, %s2718_s14  ;;  %v2465_v46 = vld [vmem:[%s4255_s1 + $0x80] sm:$0xff]  ;;  %v300_v49 = vld [vmem:[%s4255_s1 + $0x18] sm:$0xff]  ;;  %v2442_v52 = vld [vmem:[%s4255_s1 + $0x48] sm:$0xff]  ;;  %vm1153_vm7 = vcmask 523264  }
  0x17   : > { %v280_v0 = vld [vmem:[%s3123_s17 + $0x18] sm:$0xff]  ;;  %v278_v1 = vld [vmem:[%s3123_s17 + $0x8] sm:$0xff]  ;;  %v279_v2 = vld [vmem:[%s3123_s17 + $0x10] sm:$0xff] }
  0x18   : > { %v2769_v4 = vpack.i.bf16 %v280_v0, %v3020_v3  ;;  %v2779_v5 = vpack.i.bf16 %v278_v1, %v279_v2  ;;  %634 = vmatpush.msra.mxu3 %v280_v0  ;;  %v277_v6 = vld [vmem:[%s3123_s17] sm:$0xff]  ;;  %v2466_v53 = vld [vmem:[%s4255_s1 + $0x88] sm:$0xff] }
  0x19   : > { %v2485_v51 = vld [vmem:[%s4255_s1 + $0xe0] sm:$0xff] }
  0x1a   : > { %2770 = vrot.lane.b32.xlu0 %v2769_v4, %s3021_s18  ;;  %2780 = vrot.lane.b32.xlu1 %v2779_v5, %s3021_s18  ;;  %v301_v61 = vld [vmem:[%s4255_s1 + $0x20] sm:$0xff] }
  0x1b   : > { %2790 = vrot.lane.b32.xlu2 %v2769_v4, %s3022_s19  ;;  %635 = vmatpush.msra.mxu3 %v279_v2 }
  0x1d   : > { %636 = vmatpush.msra.mxu3 %v278_v1  ;;  %v2486_v1 = vld [vmem:[%s4255_s1 + $0xe8] sm:$0xff] }
  0x1f   : > { %637 = vmatpush.msra.mxu3 %v277_v6 }
  0x20   : > { %2489 = vmatmul.msk.f32.vlgmr.msra.gmra.mxu3 %vm338_vm1, %v2481_v14 }
  0x22   : > { %2775 = vrot.lane.b32.xlu0 %v2769_v4, %s3023_s20  ;;  %2785 = vrot.lane.b32.xlu1 %v2779_v5, %s3023_s20 }
  0x23   : > { %2795 = vrot.lane.b32.xlu2 %v2779_v5, %s3022_s19 }
  0x28   : > { %2490 = vmatmul.msk.f32.gmra.mxu3 %vm338_vm1, %v2482_v20 }
  0x2a   : > { %321 = vrot.lane.b32.xlu1 %v277_v6, %s3023_s20  ;;  %499 = vrot.lane.b32.xlu0 %v277_v6, %s3021_s18 }
  0x2b   : > { %406 = vrot.lane.b32.xlu2 %v277_v6, %s3022_s19 }
  0x30   : > { %2491 = vmatmul.msk.f32.gmra.mxu3 %vm338_vm1, %v2483_v29 }
  0x32   : > { %2805 = vrot.lane.b32.xlu1 %v2769_v4, %s3024_s21  ;;  %2800 = vrot.lane.b32.xlu0 %v2769_v4, %s3025_s22 }
  0x33   : > { %2810 = vrot.lane.b32.xlu2 %v2779_v5, %s3025_s22 }
  0x38   : > { %2492 = vmatmul.msk.f32.gmra.mxu3 %vm338_vm1, %v2484_v40  ;;  %v2469_v40 = vld [vmem:[%s4255_s1 + $0xa0] sm:$0xff] }
  0x3a   : > { %2820 = vrot.lane.b32.xlu1 %v2769_v4, %s4262_s23  ;;  %2815 = vrot.lane.b32.xlu0 %v2779_v5, %s3024_s21  ;;  %v287_v4 = vld [vmem:[%s4259_s5 + $0x30] sm:$0xff] }
  0x3b   : > { %2825 = vrot.lane.b32.xlu2 %v2779_v5, %s4262_s23 }
  0x40   : > { %2493 = vmatmul.msk.f32.gmra.mxu3 %vm338_vm1, %v2485_v51  ;;  %v2471_v51 = vld [vmem:[%s4255_s1 + $0xb0] sm:$0xff] }
  0x42   : > { %680 = vrot.lane.b32.xlu1 %v277_v6, %s3024_s21  ;;  %882 = vrot.lane.b32.xlu0 %v277_v6, %s3025_s22 }
  0x43   : > { %781 = vrot.lane.b32.xlu2 %v277_v6, %s4262_s23  ;;  %v3027_v6 = vmov 0   ;;  %s2719_s23 = sshll.u32 %s3091_s28, 6 }
  0x44   : > { %2830 = vset.pattern.permute.xlu1 %v3027_v6  ;;  %2829 = vset.pattern.permute.xlu0 %v3027_v6  ;;  %s2368_s19 = scalar_lea.hbm %s4261_s7, %s2719_s23 }
  0x45   : > { %2831 = vset.pattern.permute.xlu2 %v3027_v6  ;;  %v2499_v6 = vld [vmem:[%s4255_s1 + $0x110] sm:$0xff]  ;;  %s2371_s22 = sshll.u32 %s2368_s19, 4  ;;  %s2372_s22 = int_to_ptr.hbm [resolvable:$true] %s2371_s22 }
  0x46   : > { %s2970_s8 = sshra.s32 %s2372_s22, 4  ;;  %s2971_s8 = int_to_ptr.hbm [resolvable:$true] %s2970_s8 }
  0x47   : > { %p2977_p0 = scmp.lt.s32.totalorder %s2971_s8, %s4261_s7 }
  0x48   : > { %2494 = vmatmul.msk.f32.gmra.mxu3 %vm338_vm1, %v2486_v1  ;;  %v292_v1 = vld [vmem:[%s4260_s6 + $0x18] sm:$0xff] }
  0x4a   : > { %1006 = vperm.xlu1 %2830, %v287_v4   ;;  %v2517_v4 = vld [vmem:[%s4255_s1 + $0x160] sm:$0xff] }
  0x75   : > { %v2791_v7 = vpop.permute.xlu2 %2790 }
  0x76   : > { %v2793_v8 = vunpack.i.h.bf16 %v2791_v7  ;;  %v2792_v9 = vunpack.i.l.bf16 %v2791_v7  ;;  %v2443_v7 = vld [vmem:[%s4255_s1 + $0x50] sm:$0xff] }
  0x78   : > { %v418_v10 = vsel %vm414_vm0, %v2792_v9, %v2793_v8  ;;  %v2467_v8 = vld [vmem:[%s4255_s1 + $0x90] sm:$0xff] }
  0x79   : > { %459 = vmatpush.msra.mxu1 %v418_v10 }
  0x7d   : > { %v2796_v11 = vpop.permute.xlu2 %2795 }
  0x7e   : > { %v2798_v12 = vunpack.i.h.bf16 %v2796_v11  ;;  %v2797_v13 = vunpack.i.l.bf16 %v2796_v11 }
  0x80   : > { %v417_v15 = vsel %vm414_vm0, %v2792_v9, %v2797_v13  ;;  %v416_v16 = vsel %vm414_vm0, %v2792_v9, %v2798_v12 }
  0x81   : > { %460 = vmatpush.msra.mxu1 %v417_v15 }
  0x83   : > { %461 = vmatpush.msra.mxu1 %v416_v16  ;;  %v302_v16 = vld [vmem:[%s4255_s1 + $0x28] sm:$0xff] }
  0x85   : > { %v407_v17 = vpop.permute.xlu2 %406 }
  0x86   : > { %v415_v19 = vsel %vm414_vm0, %v2792_v9, %v407_v17 }
  0x87   : > { %462 = vmatpush.msra.mxu1 %v415_v19 }
  0x88   : > { %2457 = vmatmul.msk.f32.vlgmr.msra.gmra.mxu1 %vm338_vm1, %v297_v18 }
  0x8c   : > { %v2771_v21 = vpop.permute.xlu0 %2770  ;;  %v2781_v22 = vpop.permute.xlu1 %2780 }
  0x8d   : > { %v2773_v23 = vunpack.i.h.bf16 %v2771_v21  ;;  %v3157_v24 = vunpack.i.l.bf16 %v2771_v21  ;;  %v2782_v25 = vunpack.i.l.bf16 %v2781_v22  ;;  %v2783_v27 = vunpack.i.h.bf16 %v2781_v22  ;;  %v2811_v50 = vpop.permute.xlu2 %2810  ;;  %v2487_v21 = vld [vmem:[%s4255_s1 + $0xf0] sm:$0xff] }
  0x8e   : > { %v2812_v56 = vunpack.i.l.bf16 %v2811_v50  ;;  %v2813_v62 = vunpack.i.h.bf16 %v2811_v50  ;;  %2495 = vmatmul.msk.f32.gmra.mxu3 %vm338_vm1, %v2487_v21  ;;  %v2447_v50 = vld [vmem:[%s4255_s1 + $0x70] sm:$0xff] }
  0x8f   : > { %v511_v28 = vsel %vm507_vm2, %v3157_v24, %v2773_v23  ;;  %v510_v30 = vsel %vm507_vm2, %v3157_v24, %v2782_v25  ;;  %v509_v31 = vsel %vm507_vm2, %v3157_v24, %v2783_v27  ;;  %v286_v23 = vld [vmem:[%s4259_s5 + $0x28] sm:$0xff]  ;;  %v2444_v27 = vld [vmem:[%s4255_s1 + $0x58] sm:$0xff] }
  0x90   : > { %552 = vmatpush.msra.mxu2 %v511_v28  ;;  %2458 = vmatmul.msk.f32.gmra.mxu1 %vm338_vm1, %v298_v26  ;;  %v2468_v28 = vld [vmem:[%s4255_s1 + $0x98] sm:$0xff] }
  0x91   : > { %1001 = vperm.xlu1 %2830, %v286_v23   ;;  %v2536_v23 = vld [vmem:[%s4255_s1 + $0x1b8] sm:$0xff] }
  0x92   : > { %553 = vmatpush.msra.mxu2 %v510_v30 }
  0x94   : > { %v2776_v32 = vpop.permute.xlu0 %2775  ;;  %v2786_v33 = vpop.permute.xlu1 %2785  ;;  %554 = vmatpush.msra.mxu2 %v509_v31 }
  0x95   : > { %v2778_v34 = vunpack.i.h.bf16 %v2776_v32  ;;  %v3173_v35 = vunpack.i.l.bf16 %v2776_v32  ;;  %v2787_v36 = vunpack.i.l.bf16 %v2786_v33  ;;  %v2788_v38 = vunpack.i.h.bf16 %v2786_v33  ;;  %v2826_v2 = vpop.permute.xlu2 %2825 }
  0x96   : > { %v2827_v11 = vunpack.i.l.bf16 %v2826_v2  ;;  %v2828_v17 = vunpack.i.h.bf16 %v2826_v2  ;;  %v2498_v2 = vld [vmem:[%s4255_s1 + $0x108] sm:$0xff] }
  0x97   : > { %v333_v39 = vsel %vm329_vm3, %v3173_v35, %v2778_v34  ;;  %v332_v41 = vsel %vm329_vm3, %v3173_v35, %v2787_v36  ;;  %v331_v42 = vsel %vm329_vm3, %v3173_v35, %v2788_v38  ;;  %v303_v34 = vld [vmem:[%s4255_s1 + $0x30] sm:$0xff]  ;;  %v2488_v36 = vld [vmem:[%s4255_s1 + $0xf8] sm:$0xff] }
  0x98   : > { %375 = vmatpush.msra.mxu0 %v333_v39  ;;  %2459 = vmatmul.msk.f32.gmra.mxu1 %vm338_vm1, %v299_v37  ;;  %v294_v37 = vld [vmem:[%s4260_s6 + $0x28] sm:$0xff]  ;;  %v288_v38 = vld [vmem:[%s4259_s5 + $0x38] sm:$0xff]  ;;  %v2445_v39 = vld [vmem:[%s4255_s1 + $0x60] sm:$0xff] }
  0x99   : > { %2496 = vmatmul.msk.f32.gmra.mxu3 %vm338_vm1, %v2488_v36  ;;  %1011 = vperm.xlu0 %2829, %v288_v38  }
  0x9a   : > { %376 = vmatpush.msra.mxu0 %v332_v41  ;;  %1049 = vperm.xlu1 %2830, %v294_v37   ;;  %v304_v41 = vld [vmem:[%s4255_s1 + $0x38] sm:$0xff] }
  0x9c   : > { %377 = vmatpush.msra.mxu0 %v331_v42  ;;  %v322_v43 = vpop.permute.xlu1 %321  ;;  %v500_v44 = vpop.permute.xlu0 %499  ;;  %v285_v42 = vld [vmem:[%s4259_s5 + $0x20] sm:$0xff] }
  0x9d   : > { %v330_v47 = vsel %vm329_vm3, %v3173_v35, %v322_v43  ;;  %v508_v48 = vsel %vm507_vm2, %v3157_v24, %v500_v44  ;;  %v782_v25 = vpop.permute.xlu2 %781  ;;  %v283_v43 = vld [vmem:[%s4259_s5 + $0x10] sm:$0xff]  ;;  %v2446_v44 = vld [vmem:[%s4255_s1 + $0x68] sm:$0xff] }
  0x9e   : > { %378 = vmatpush.msra.mxu0 %v330_v47  ;;  %555 = vmatpush.msra.mxu2 %v508_v48  ;;  %v296_v47 = vld [vmem:[%s4260_s6 + $0x38] sm:$0xff]  ;;  %v291_v48 = vld [vmem:[%s4260_s6 + $0x10] sm:$0xff] }
  0x9f   : > { %2449 = vmatmul.msk.f32.vlgmr.msra.gmra.mxu0 %vm338_vm1, %v2441_v45  ;;  %2473 = vmatmul.msk.f32.vlgmr.msra.gmra.mxu2 %vm338_vm1, %v2465_v46  ;;  %v2470_v45 = vld [vmem:[%s4255_s1 + $0xa8] sm:$0xff]  ;;  %v2513_v46 = vld [vmem:[%s4255_s1 + $0x140] sm:$0xff] }
  0xa0   : > { %2460 = vmatmul.msk.f32.gmra.mxu1 %vm338_vm1, %v300_v49  ;;  %1059 = vperm.xlu2 %2831, %v296_v47   ;;  %v293_v49 = vld [vmem:[%s4260_s6 + $0x20] sm:$0xff] }
  0xa1   : > { %996 = vperm.xlu0 %2829, %v285_v42  }
  0xa2   : > { %986 = vperm.xlu1 %2830, %v283_v43  }
  0xa3   : > { %v639_v43 = vpop.f32.mrf.mxu3 }
  0xa4   : > { %v2806_v54 = vpop.permute.xlu1 %2805  ;;  %v2801_v55 = vpop.permute.xlu0 %2800 }
  0xa5   : > { %v2808_v57 = vunpack.i.h.bf16 %v2806_v54  ;;  %v3215_v58 = vunpack.i.l.bf16 %v2806_v54  ;;  %v2803_v59 = vunpack.i.h.bf16 %v2801_v55  ;;  %v2802_v60 = vunpack.i.l.bf16 %v2801_v55  ;;  %v289_v54 = vld [vmem:[%s4260_s6] sm:$0xff]  ;;  %v282_v55 = vld [vmem:[%s4259_s5 + $0x8] sm:$0xff] }
  0xa7   : > { %2450 = vmatmul.msk.f32.gmra.mxu0 %vm338_vm1, %v2442_v52  ;;  %2474 = vmatmul.msk.f32.gmra.mxu2 %vm338_vm1, %v2466_v53  ;;  %v694_v63 = vsel %vm690_vm4, %v2808_v57, %v3215_v58  ;;  %v896_v0 = vsel %vm892_vm5, %v2803_v59, %v2802_v60  ;;  %v895_v3 = vsel %vm892_vm5, %v2812_v56, %v2802_v60  ;;  %v2514_v52 = vld [vmem:[%s4255_s1 + $0x148] sm:$0xff]  ;;  %v295_v53 = vld [vmem:[%s4260_s6 + $0x30] sm:$0xff]  ;;  %v2448_v56 = vld [vmem:[%s4255_s1 + $0x78] sm:$0xff] }
  0xa8   : > { %2461 = vmatmul.msk.f32.gmra.mxu1 %vm338_vm1, %v301_v61  ;;  %735 = vmatpush.msrb.mxu0 %v694_v63  ;;  %v894_v5 = vsel %vm892_vm5, %v2813_v62, %v2802_v60  ;;  %v2472_v57 = vld [vmem:[%s4255_s1 + $0xb8] sm:$0xff]  ;;  %v2515_v59 = vld [vmem:[%s4255_s1 + $0x150] sm:$0xff]  ;;  %v290_v61 = vld [vmem:[%s4260_s6 + $0x8] sm:$0xff] }
  0xa9   : > { %937 = vmatpush.msrb.mxu2 %v896_v0  ;;  %1044 = vperm.xlu0 %2829, %v293_v49   ;;  %v2497_v62 = vld [vmem:[%s4255_s1 + $0x100] sm:$0xff]  ;;  %v2516_v0 = vld [vmem:[%s4255_s1 + $0x158] sm:$0xff] }
  0xaa   : > { %1034 = vperm.xlu1 %2830, %v291_v48   ;;  %1054 = vperm.xlu2 %2831, %v295_v53   ;;  %v2529_v63 = vld [vmem:[%s4255_s1 + $0x180] sm:$0xff] }
  0xab   : > { %938 = vmatpush.msrb.mxu2 %v895_v3  ;;  %v2530_v3 = vld [vmem:[%s4255_s1 + $0x188] sm:$0xff]  ;;  %v3477_v48 = vpop.f32.mrf.mxu3 }
  0xac   : > { %v2821_v9 = vpop.permute.xlu1 %2820  ;;  %v2816_v10 = vpop.permute.xlu0 %2815 }
  0xad   : > { %v2823_v12 = vunpack.i.h.bf16 %v2821_v9  ;;  %v3241_v13 = vunpack.i.l.bf16 %v2821_v9  ;;  %v2818_v14 = vunpack.i.h.bf16 %v2816_v10  ;;  %v2817_v15 = vunpack.i.l.bf16 %v2816_v10  ;;  %939 = vmatpush.msrb.mxu2 %v894_v5  ;;  %v281_v5 = vld [vmem:[%s4259_s5] sm:$0xff]  ;;  %v2500_v9 = vld [vmem:[%s4255_s1 + $0x118] sm:$0xff] }
  0xae   : > { %v2532_v10 = vld [vmem:[%s4255_s1 + $0x198] sm:$0xff] }
  0xaf   : > { %2451 = vmatmul.msk.f32.gmra.mxu0 %vm338_vm1, %v2443_v7  ;;  %2475 = vmatmul.msk.f32.gmra.mxu2 %vm338_vm1, %v2467_v8  ;;  %v693_v18 = vsel %vm690_vm4, %v2817_v15, %v3215_v58  ;;  %v692_v19 = vsel %vm690_vm4, %v2818_v14, %v3215_v58  ;;  %v795_v20 = vsel %vm791_vm6, %v2823_v12, %v3241_v13  ;;  %v2531_v7 = vld [vmem:[%s4255_s1 + $0x190] sm:$0xff]  ;;  %v2518_v8 = vld [vmem:[%s4255_s1 + $0x168] sm:$0xff]  ;;  %v2501_v12 = vld [vmem:[%s4255_s1 + $0x120] sm:$0xff] }
  0xb0   : > { %736 = vmatpush.msrb.mxu0 %v693_v18  ;;  %2462 = vmatmul.msk.f32.gmra.mxu1 %vm338_vm1, %v302_v16  ;;  %v794_v22 = vsel %vm791_vm6, %v2827_v11, %v3241_v13  ;;  %v793_v26 = vsel %vm791_vm6, %v2828_v17, %v3241_v13  ;;  %v792_v33 = vsel %vm791_vm6, %v782_v25, %v3241_v13  ;;  %v2519_v11 = vld [vmem:[%s4255_s1 + $0x170] sm:$0xff]  ;;  %v2533_v14 = vld [vmem:[%s4255_s1 + $0x1a0] sm:$0xff]  ;;  %v2520_v15 = vld [vmem:[%s4255_s1 + $0x178] sm:$0xff] }
  0xb1   : > { %836 = vmatpush.msrb.mxu1 %v795_v20  ;;  %981 = vperm.xlu0 %2829, %v282_v55   ;;  %v2502_v16 = vld [vmem:[%s4255_s1 + $0x128] sm:$0xff]  ;;  %v2535_v20 = vld [vmem:[%s4255_s1 + $0x1b0] sm:$0xff] }
  0xb2   : > { %737 = vmatpush.msrb.mxu0 %v692_v19  ;;  %1024 = vperm.xlu1 %2830, %v289_v54   ;;  %v2534_v17 = vld [vmem:[%s4255_s1 + $0x1a8] sm:$0xff]  ;;  %v2503_v19 = vld [vmem:[%s4255_s1 + $0x130] sm:$0xff] }
  0xb3   : > { %837 = vmatpush.msrb.mxu1 %v794_v22  ;;  %v2504_v22 = vld [vmem:[%s4255_s1 + $0x138] sm:$0xff] }
  0xb4   : > { %v681_v29 = vpop.permute.xlu1 %680  ;;  %v883_v30 = vpop.permute.xlu0 %882 }
  0xb5   : > { %v691_v31 = vsel %vm690_vm4, %v681_v29, %v3215_v58  ;;  %v893_v32 = vsel %vm892_vm5, %v883_v30, %v2802_v60  ;;  %838 = vmatpush.msrb.mxu1 %v793_v26  ;;  %v284_v60 = vld [vmem:[%s4259_s5 + $0x18] sm:$0xff] }
  0xb6   : > { %738 = vmatpush.msrb.mxu0 %v691_v31  ;;  %940 = vmatpush.msrb.mxu2 %v893_v32 }
  0xb7   : > { %2452 = vmatmul.msk.f32.gmra.mxu0 %vm338_vm1, %v2444_v27  ;;  %2476 = vmatmul.msk.f32.gmra.mxu2 %vm338_vm1, %v2468_v28 }
  0xb8   : > { %839 = vmatpush.msrb.mxu1 %v792_v33  ;;  %991 = vperm.xlu2 %2831, %v284_v60  }
  0xb9   : > { %2463 = vmatmul.msk.f32.gmra.mxu1 %vm338_vm1, %v303_v34  ;;  %1029 = vperm.xlu0 %2829, %v290_v61  }
  0xbc   : > { %v3479_v49 = vpop.permute.xlu1 %1006 }
  0xbf   : > { %2453 = vmatmul.msk.f32.gmra.mxu0 %vm338_vm1, %v2445_v39  ;;  %2477 = vmatmul.msk.f32.gmra.mxu2 %vm338_vm1, %v2469_v40 }
  0xc0   : > { %1039 = vperm.xlu2 %2831, %v292_v1  }
  0xc1   : > { %2464 = vmatmul.msk.f32.gmra.mxu1 %vm338_vm1, %v304_v41 }
  0xc7   : > { %2454 = vmatmul.msk.f32.gmra.mxu0 %vm338_vm1, %v2446_v44  ;;  %2478 = vmatmul.msk.f32.gmra.mxu2 %vm338_vm1, %v2470_v45 }
  0xc8   : > { %976 = vperm.xlu2 %2831, %v281_v5  }
  0xc9   : > { %2521 = vmatmul.msk.f32.vlgmr.msrb.gmra.mxu1 %vm338_vm1, %v2513_v46 }
  0xcf   : > { %2455 = vmatmul.msk.f32.gmra.mxu0 %vm338_vm1, %v2447_v50  ;;  %2479 = vmatmul.msk.f32.gmra.mxu2 %vm338_vm1, %v2471_v51 }
  0xd1   : > { %2522 = vmatmul.msk.f32.gmra.mxu1 %vm338_vm1, %v2514_v52 }
  0xd7   : > { %2456 = vmatmul.msk.f32.gmra.mxu0 %vm338_vm1, %v2448_v56  ;;  %2480 = vmatmul.msk.f32.gmra.mxu2 %vm338_vm1, %v2472_v57  ;;  %v645_v57 = vpop.f32.mrf.mxu3 }
  0xd9   : > { %2523 = vmatmul.msk.f32.gmra.mxu1 %vm338_vm1, %v2515_v59 }
  0xdf   : > { %2505 = vmatmul.msk.f32.vlgmr.msrb.gmra.mxu0 %vm338_vm1, %v2497_v62  ;;  %2537 = vmatmul.msk.f32.vlgmr.msrb.gmra.mxu2 %vm338_vm1, %v2529_v63 }
  0xe1   : > { %2524 = vmatmul.msk.f32.gmra.mxu1 %vm338_vm1, %v2516_v0 }
  0xe7   : > { %2506 = vmatmul.msk.f32.gmra.mxu0 %vm338_vm1, %v2498_v2  ;;  %2538 = vmatmul.msk.f32.gmra.mxu2 %vm338_vm1, %v2530_v3 }
  0xe9   : > { %2525 = vmatmul.msk.f32.gmra.mxu1 %vm338_vm1, %v2517_v4  ;;  %v648_v4 = vpop.f32.mrf.mxu3 }
  0xef   : > { %2507 = vmatmul.msk.f32.gmra.mxu0 %vm338_vm1, %v2499_v6  ;;  %2539 = vmatmul.msk.f32.gmra.mxu2 %vm338_vm1, %v2531_v7 }
  0xf1   : > { %2526 = vmatmul.msk.f32.gmra.mxu1 %vm338_vm1, %v2518_v8 }
  0xf7   : > { %2508 = vmatmul.msk.f32.gmra.mxu0 %vm338_vm1, %v2500_v9  ;;  %2540 = vmatmul.msk.f32.gmra.mxu2 %vm338_vm1, %v2532_v10 }
  0xf9   : > { %2527 = vmatmul.msk.f32.gmra.mxu1 %vm338_vm1, %v2519_v11 }
  0xfa   : > { %v3489_v62 = vpop.permute.xlu2 %1059 }
  0xff   : > { %2509 = vmatmul.msk.f32.gmra.mxu0 %vm338_vm1, %v2501_v12  ;;  %2541 = vmatmul.msk.f32.gmra.mxu2 %vm338_vm1, %v2533_v14 }
 0x101   : > { %2528 = vmatmul.msk.f32.gmra.mxu1 %vm338_vm1, %v2520_v15 }
 0x103   : > { %v3487_v60 = vpop.permute.xlu1 %1001 }
 0x104   : > { %v3497_v7 = vpop.permute.xlu2 %1054 }
 0x105   : > { %v464_v18 = vpop.f32.mrf.mxu1 }
 0x107   : > { %2510 = vmatmul.msk.f32.gmra.mxu0 %vm338_vm1, %v2502_v16  ;;  %2542 = vmatmul.msk.f32.gmra.mxu2 %vm338_vm1, %v2534_v17  ;;  %v651_v16 = vpop.f32.mrf.mxu3 }
 0x10c   : > { %v3495_v5 = vpop.permute.xlu1 %1049 }
 0x10d   : > { %v3451_v21 = vpop.f32.mrf.mxu1 }
 0x10f   : > { %2511 = vmatmul.msk.f32.gmra.mxu0 %vm338_vm1, %v2503_v19  ;;  %2543 = vmatmul.msk.f32.gmra.mxu2 %vm338_vm1, %v2535_v20 }
 0x114   : > { %v987_v17 = vpop.permute.xlu1 %986 }
 0x115   : > { %v470_v25 = vpop.f32.mrf.mxu1 }
 0x117   : > { %2512 = vmatmul.msk.f32.gmra.mxu0 %vm338_vm1, %v2504_v22  ;;  %2544 = vmatmul.msk.f32.gmra.mxu2 %vm338_vm1, %v2536_v23  ;;  %v992_v22 = vpop.permute.xlu2 %991 }
 0x11c   : > { %v380_v26 = vpop.f32.mrf.mxu0 }
 0x11d   : > { %v473_v27 = vpop.f32.mrf.mxu1  ;;  %v465_v51 = vadd.f32 %v464_v18, %v380_v26 }
 0x122   : > { %v557_v28 = vpop.f32.mrf.mxu2 }
 0x123   : > { %v581_v52 = vadd.f32 %v557_v28, %v465_v51 }
 0x124   : > { %v3463_v29 = vpop.f32.mrf.mxu0 }
 0x125   : > { %v476_v30 = vpop.f32.mrf.mxu1  ;;  %v663_v55 = vadd.f32 %v639_v43, %v581_v52  ;;  %v1035_v52 = vpop.permute.xlu1 %1034 }
 0x12a   : > { %v3465_v31 = vpop.f32.mrf.mxu2 }
 0x12c   : > { %v386_v32 = vpop.f32.mrf.mxu0 }
 0x12d   : > { %v3467_v34 = vpop.f32.mrf.mxu1  ;;  %v471_v3 = vadd.f32 %v470_v25, %v386_v32  ;;  %v3501_v32 = vpop.permute.xlu0 %1011 }
 0x132   : > { %v563_v33 = vpop.f32.mrf.mxu2 }
 0x133   : > { %v583_v6 = vadd.f32 %v563_v33, %v471_v3 }
 0x134   : > { %v389_v36 = vpop.f32.mrf.mxu0 }
 0x135   : > { %v665_v10 = vadd.f32 %v645_v57, %v583_v6  ;;  %v474_v11 = vadd.f32 %v473_v27, %v389_v36  ;;  %v654_v36 = vpop.f32.mrf.mxu3  ;;  %v997_v3 = vpop.permute.xlu0 %996 }
 0x136   : > { %v3469_v39 = vpop.f32.mrf.mxu1 }
 0x13a   : > { %v566_v37 = vpop.f32.mrf.mxu2 }
 0x13b   : > { %v584_v14 = vadd.f32 %v566_v37, %v474_v11 }
 0x13c   : > { %v392_v38 = vpop.f32.mrf.mxu0 }
 0x13d   : > { %v666_v19 = vadd.f32 %v648_v4, %v584_v14  ;;  %v477_v28 = vadd.f32 %v476_v30, %v392_v38  ;;  %v657_v14 = vpop.f32.mrf.mxu3 }
 0x13e   : > { %v3471_v42 = vpop.f32.mrf.mxu1 }
 0x142   : > { %v569_v40 = vpop.f32.mrf.mxu2 }
 0x143   : > { %v585_v43 = vadd.f32 %v569_v40, %v477_v28 }
 0x144   : > { %v395_v41 = vpop.f32.mrf.mxu0 }
 0x145   : > { %v480_v57 = vadd.f32 %v3467_v34, %v395_v41 }
 0x146   : > { %v841_v46 = vpop.f32.mrf.mxu1 }
 0x14a   : > { %v572_v44 = vpop.f32.mrf.mxu2 }
 0x14c   : > { %v3473_v45 = vpop.f32.mrf.mxu0 }
 0x14e   : > { %v3485_v54 = vpop.f32.mrf.mxu1 }
 0x152   : > { %v3475_v47 = vpop.f32.mrf.mxu2 }
 0x154   : > { %v3481_v50 = vpop.f32.mrf.mxu0 }
 0x155   : > { %v486_v28 = vadd.f32 %v3471_v42, %v3481_v50 }
 0x156   : > { %v847_v2 = vpop.f32.mrf.mxu1 }
 0x15a   : > { %v3483_v53 = vpop.f32.mrf.mxu2 }
 0x15c   : > { %v740_v56 = vpop.f32.mrf.mxu0 }
 0x15d   : > { %v764_v59 = vadd.f32 %v740_v56, %v663_v55  ;;  %v667_v56 = vadd.f32 %v651_v16, %v585_v43 }
 0x15e   : > { %v850_v12 = vpop.f32.mrf.mxu1 }
 0x15f   : > { %v865_v61 = vadd.f32 %v841_v46, %v764_v59 }
 0x162   : > { %v942_v63 = vpop.f32.mrf.mxu2 }
 0x163   : > { %v3491_v0 = vadd.f32 %v942_v63, %v865_v61  ;;  %v1040_v63 = vpop.permute.xlu2 %1039 }
 0x164   : > { %v3493_v1 = vpop.f32.mrf.mxu0 }
 0x166   : > { %v853_v33 = vpop.f32.mrf.mxu1 }
 0x16a   : > { %v3499_v8 = vpop.f32.mrf.mxu2 }
 0x16c   : > { %v746_v9 = vpop.f32.mrf.mxu0 }
 0x16d   : > { %v766_v15 = vadd.f32 %v746_v9, %v665_v10 }
 0x16e   : > { %v856_v9 = vpop.f32.mrf.mxu1 }
 0x16f   : > { %v867_v20 = vadd.f32 %v847_v2, %v766_v15  ;;  %v586_v2 = vadd.f32 %v572_v44, %v480_v57  ;;  %v483_v15 = vadd.f32 %v3469_v39, %v3473_v45  ;;  %v588_v39 = vadd.f32 %v3483_v53, %v486_v28 }
 0x171   : > { %v668_v10 = vadd.f32 %v654_v36, %v586_v2  ;;  %v587_v16 = vadd.f32 %v3475_v47, %v483_v15  ;;  %v2551_v15 = vld [vmem:[%s4259_s5 + $0x70] sm:$0xff] }
 0x172   : > { %v948_v18 = vpop.f32.mrf.mxu2 }
 0x173   : > { %v968_v25 = vadd.f32 %v948_v18, %v867_v20  ;;  %v1045_v20 = vpop.permute.xlu0 %1044 }
 0x174   : > { %v749_v23 = vpop.f32.mrf.mxu0 }
 0x175   : > { %v767_v26 = vadd.f32 %v749_v23, %v666_v19  ;;  %v1016_v46 = vmul.f32 %v987_v17, %v968_v25 }
 0x176   : > { %v859_v25 = vpop.f32.mrf.mxu1 }
 0x177   : > { %v868_v51 = vadd.f32 %v850_v12, %v767_v26  ;;  %v3504_v59 = vadd.f32 %v1035_v52, %v1016_v46  ;;  %v669_v26 = vadd.f32 %v657_v14, %v587_v16  ;;  %v468_v46 = vadd.f32 %v3451_v21, %v3463_v29  ;;  %v2558_v16 = vld [vmem:[%s4260_s6 + $0x68] sm:$0xff] }
 0x179   : > { %v1072_v40 = vmax.f32 %v3504_v59, 0.0  ;;  %v2549_v59 = vld [vmem:[%s4259_s5 + $0x60] sm:$0xff] }
 0x17a   : > { %v951_v27 = vpop.f32.mrf.mxu2 }
 0x17b   : > { %v969_v37 = vadd.f32 %v951_v27, %v868_v51  ;;  %v582_v51 = vadd.f32 %v3465_v31, %v468_v46  ;;  %v660_v27 = vpop.f32.mrf.mxu3  ;;  %v982_v31 = vpop.permute.xlu0 %981 }
 0x17c   : > { %v752_v55 = vpop.f32.mrf.mxu0 }
 0x17d   : > { %v1017_v61 = vmul.f32 %v992_v22, %v969_v37  ;;  %v768_v38 = vadd.f32 %v752_v55, %v667_v56  ;;  %v670_v55 = vadd.f32 %v660_v27, %v588_v39  ;;  %v664_v50 = vadd.f32 %v3477_v48, %v582_v51 }
 0x17e   : > { %v862_v29 = vpop.f32.mrf.mxu1 }
 0x17f   : > { %v3506_v30 = vadd.f32 %v1040_v63, %v1017_v61  ;;  %v869_v11 = vadd.f32 %v853_v33, %v768_v38  ;;  %v765_v21 = vadd.f32 %v3493_v1, %v664_v50 }
 0x181   : > { %v1073_v4 = vmax.f32 %v3506_v30, 0.0  ;;  %v866_v63 = vadd.f32 %v3485_v54, %v765_v21  ;;  %v1025_v54 = vpop.permute.xlu1 %1024  ;;  %v2545_v30 = vld [vmem:[%s4259_s5 + $0x40] sm:$0xff] }
 0x182   : > { %v954_v6 = vpop.f32.mrf.mxu2 }
 0x183   : > { %v3514_v34 = vpack.i.bf16 %v1072_v40, %v1073_v4  ;;  %v970_v44 = vadd.f32 %v954_v6, %v869_v11  ;;  %v967_v48 = vadd.f32 %v3499_v8, %v866_v63  ;;  %v1030_v11 = vpop.permute.xlu0 %1029 }
 0x184   : > { %v755_v41 = vpop.f32.mrf.mxu0 }
 0x185   : > { %v769_v12 = vadd.f32 %v755_v41, %v668_v10  ;;  %2843 = vrot.lane.b32.xlu1 %v3514_v34, %s3021_s18  ;;  %v1018_v17 = vmul.f32 %v997_v3, %v970_v44  ;;  %v1015_v10 = vmul.f32 %v982_v31, %v967_v48  ;;  %v2585_v31 = vld [vmem:[%s4256_s2 + $0x80] sm:$0xff] }
 0x187   : > { %v870_v18 = vadd.f32 %v856_v9, %v769_v12  ;;  %v1066_v33 = vadd.f32 %v1045_v20, %v1018_v17  ;;  %v977_v9 = vpop.permute.xlu2 %976  ;;  %v1063_v14 = vadd.f32 %v1030_v11, %v1015_v10  ;;  %v2547_v17 = vld [vmem:[%s4259_s5 + $0x50] sm:$0xff]  ;;  %v2550_v20 = vld [vmem:[%s4259_s5 + $0x68] sm:$0xff] }
 0x188   : > { %v1014_v44 = vmul.f32 %v977_v9, %v3491_v0  ;;  %v2586_v10 = vld [vmem:[%s4256_s2 + $0x88] sm:$0xff] }
 0x189   : > { %v1074_v36 = vmax.f32 %v1066_v33, 0.0  ;;  %v1071_v8 = vmax.f32 %v1063_v14, 0.0 }
 0x18a   : > { %v957_v19 = vpop.f32.mrf.mxu2 }
 0x18b   : > { %v971_v22 = vadd.f32 %v957_v19, %v870_v18  ;;  %v2555_v18 = vld [vmem:[%s4260_s6 + $0x50] sm:$0xff]  ;;  %v2556_v19 = vld [vmem:[%s4260_s6 + $0x58] sm:$0xff] }
 0x18c   : > { %v758_v23 = vpop.f32.mrf.mxu0 }
 0x18d   : > { %v1019_v43 = vmul.f32 %v3487_v60, %v971_v22  ;;  %v770_v47 = vadd.f32 %v758_v23, %v669_v26  ;;  %v2553_v22 = vld [vmem:[%s4260_s6 + $0x40] sm:$0xff]  ;;  %v2560_v23 = vld [vmem:[%s4260_s6 + $0x78] sm:$0xff]  ;;  %v2554_v26 = vld [vmem:[%s4260_s6 + $0x48] sm:$0xff] }
 0x18f   : > { %v1067_v45 = vadd.f32 %v3495_v5, %v1019_v43  ;;  %v871_v56 = vadd.f32 %v859_v25, %v770_v47  ;;  %v2557_v25 = vld [vmem:[%s4260_s6 + $0x60] sm:$0xff] }
 0x191   : > { %v1075_v37 = vmax.f32 %v1067_v45, 0.0 }
 0x192   : > { %v960_v52 = vpop.f32.mrf.mxu2 }
 0x193   : > { %v2857_v42 = vpack.i.bf16 %v1074_v36, %v1075_v37  ;;  %v972_v57 = vadd.f32 %v960_v52, %v871_v56 }
 0x194   : > { %v761_v60 = vpop.f32.mrf.mxu0 }
 0x195   : > { %v771_v61 = vadd.f32 %v761_v60, %v670_v55  ;;  %2858 = vrot.lane.b32.xlu1 %v2857_v42, %s3023_s20  ;;  %2838 = vrot.lane.b32.xlu0 %v2857_v42, %s3021_s18  ;;  %v1020_v53 = vmul.f32 %v3479_v49, %v972_v57 }
 0x197   : > { %v872_v5 = vadd.f32 %v862_v29, %v771_v61  ;;  %v1068_v3 = vadd.f32 %v3497_v7, %v1020_v53  ;;  %v1062_v7 = vadd.f32 %v1025_v54, %v1014_v44 }
 0x199   : > { %v1076_v41 = vmax.f32 %v1068_v3, 0.0 }
 0x19a   : > { %v963_v2 = vpop.f32.mrf.mxu2 }
 0x19b   : > { %v973_v38 = vadd.f32 %v963_v2, %v872_v5  ;;  %v2561_v5 = vld [vmem:[%s4256_s2 + $0x40] sm:$0xff] }
 0x19d   : > { %v1021_v6 = vmul.f32 %v3501_v32, %v973_v38  ;;  %2853 = vrot.lane.b32.xlu0 %v2857_v42, %s3024_s21  ;;  %v2546_v32 = vld [vmem:[%s4259_s5 + $0x48] sm:$0xff] }
 0x19f   : > { %v1069_v1 = vadd.f32 %v3489_v62, %v1021_v6  ;;  %v1070_v62 = vmax.f32 %v1062_v7, 0.0 }
 0x1a1   : > { %v1077_v49 = vmax.f32 %v1069_v1, 0.0  ;;  %v2847_v0 = vpack.i.bf16 %v1070_v62, %v1071_v8 }
 0x1a3   : > { %1357 = vmatpush.msra.mxu1 %v1077_v49  ;;  %v2877_v12 = vpack.i.bf16 %v1076_v41, %v1077_v49 }
 0x1a5   : > { %2878 = vrot.lane.b32.xlu1 %v2877_v12, %s3023_s20  ;;  %2868 = vrot.lane.b32.xlu0 %v2877_v12, %s3024_s21 }
 0x1a6   : > { %2833 = vrot.lane.b32.xlu2 %v2877_v12, %s3021_s18  ;;  %1358 = vmatpush.msra.mxu1 %v1076_v41 }
 0x1a8   : > { %1359 = vmatpush.msra.mxu1 %v1075_v37 }
 0x1aa   : > { %1360 = vmatpush.msra.mxu1 %v1074_v36 }
 0x1ac   : > { %1361 = vmatpush.msra.mxu1 %v1073_v4  ;;  %v2552_v4 = vld [vmem:[%s4259_s5 + $0x78] sm:$0xff] }
 0x1ad   : > { %2883 = vrot.lane.b32.xlu1 %v3514_v34, %s3023_s20  ;;  %2873 = vrot.lane.b32.xlu0 %v3514_v34, %s3024_s21 }
 0x1ae   : > { %2848 = vrot.lane.b32.xlu2 %v2847_v0, %s3021_s18  ;;  %1362 = vmatpush.msra.mxu1 %v1072_v40  ;;  %v2548_v40 = vld [vmem:[%s4259_s5 + $0x58] sm:$0xff] }
 0x1b0   : > { %1363 = vmatpush.msra.mxu1 %v1071_v8 }
 0x1b2   : > { %1364 = vmatpush.msra.mxu1 %v1070_v62 }
 0x1b3   : > { %2593 = vmatmul.msk.f32.vlgmr.msra.gmra.mxu1 %vm1153_vm7, %v2585_v31 }
 0x1b5   : > { %2903 = vrot.lane.b32.xlu1 %v2847_v0, %s3023_s20  ;;  %2898 = vrot.lane.b32.xlu0 %v2847_v0, %s3024_s21 }
 0x1b6   : > { %2863 = vrot.lane.b32.xlu2 %v2857_v42, %s4266_s29 }
 0x1bb   : > { %2594 = vmatmul.msk.f32.gmra.mxu1 %vm1153_vm7, %v2586_v10  ;;  %v2565_v10 = vld [vmem:[%s4256_s2 + $0x60] sm:$0xff] }
 0x1bd   : > { %1633 = vperm.xlu1 %2830, %v2546_v32   ;;  %1628 = vperm.xlu0 %2829, %v2545_v30   ;;  %v2562_v30 = vld [vmem:[%s4256_s2 + $0x48] sm:$0xff] }
 0x1be   : > { %2888 = vrot.lane.b32.xlu2 %v2877_v12, %s4266_s29 }
 0x1c5   : > { %1648 = vperm.xlu1 %2830, %v2549_v59   ;;  %1643 = vperm.xlu0 %2829, %v2548_v40  }
 0x1c6   : > { %2893 = vrot.lane.b32.xlu2 %v3514_v34, %s4266_s29  ;;  %v2559_v34 = vld [vmem:[%s4260_s6 + $0x70] sm:$0xff] }
 0x1cd   : > { %1663 = vperm.xlu1 %2830, %v2552_v4   ;;  %1658 = vperm.xlu0 %2829, %v2551_v15  }
 0x1ce   : > { %2908 = vrot.lane.b32.xlu2 %v2847_v0, %s4266_s29 }
 0x1d5   : > { %1701 = vperm.xlu1 %2830, %v2558_v16   ;;  %1706 = vperm.xlu0 %2829, %v2559_v34  }
 0x1d6   : > { %1638 = vperm.xlu2 %2831, %v2547_v17  }
 0x1dd   : > { %1686 = vperm.xlu1 %2830, %v2555_v18   ;;  %1691 = vperm.xlu0 %2829, %v2556_v19  }
 0x1de   : > { %1653 = vperm.xlu2 %2831, %v2550_v20  }
 0x1e5   : > { %1676 = vperm.xlu0 %2829, %v2553_v22  }
 0x1e6   : > { %1711 = vperm.xlu2 %2831, %v2560_v23  }
 0x1ee   : > { %1696 = vperm.xlu2 %2831, %v2557_v25  }
 0x1f6   : > { %1681 = vperm.xlu2 %2831, %v2554_v26   ;;  %v2587_v26 = vld [vmem:[%s4256_s2 + $0x90] sm:$0xff] }
 0x1f7   : > { %v2844_v45 = vpop.permute.xlu1 %2843  ;;  %2595 = vmatmul.msk.f32.gmra.mxu1 %vm1153_vm7, %v2587_v26  ;;  %v2622_v26 = vld [vmem:[%s4256_s2 + $0x128] sm:$0xff] }
 0x1f8   : > { %v2845_v37 = vunpack.i.l.bf16 %v2844_v45  ;;  %v2846_v55 = vunpack.i.h.bf16 %v2844_v45 }
 0x1fa   : > { %v1140_v50 = vsel %vm507_vm2, %v3157_v24, %v2845_v37  ;;  %v1139_v29 = vsel %vm507_vm2, %v3157_v24, %v2846_v55 }
 0x200   : > { %v2834_v28 = vpop.permute.xlu2 %2833 }
 0x201   : > { %v2836_v33 = vunpack.i.h.bf16 %v2834_v28  ;;  %v2835_v43 = vunpack.i.l.bf16 %v2834_v28 }
 0x203   : > { %v1144_v46 = vsel %vm507_vm2, %v3157_v24, %v2835_v43  ;;  %v1143_v39 = vsel %vm507_vm2, %v3157_v24, %v2836_v33 }
 0x204   : > { %1186 = vmatpush.msrb.mxu3 %v1144_v46 }
 0x206   : > { %1187 = vmatpush.msrb.mxu3 %v1143_v39 }
 0x207   : > { %v2839_v47 = vpop.permute.xlu0 %2838  ;;  %v2859_v60 = vpop.permute.xlu1 %2858 }
 0x208   : > { %v2841_v51 = vunpack.i.h.bf16 %v2839_v47  ;;  %v2840_v27 = vunpack.i.l.bf16 %v2839_v47  ;;  %v2849_v36 = vpop.permute.xlu2 %2848  ;;  %v2860_v49 = vunpack.i.l.bf16 %v2859_v60  ;;  %v2861_v12 = vunpack.i.h.bf16 %v2859_v60 }
 0x209   : > { %v2850_v42 = vunpack.i.l.bf16 %v2849_v36  ;;  %v2851_v61 = vunpack.i.h.bf16 %v2849_v36 }
 0x20a   : > { %v1142_v52 = vsel %vm507_vm2, %v3157_v24, %v2840_v27  ;;  %v1141_v56 = vsel %vm507_vm2, %v3157_v24, %v2841_v51  ;;  %v1240_v4 = vsel %vm329_vm3, %v3173_v35, %v2860_v49  ;;  %v1239_v18 = vsel %vm329_vm3, %v3173_v35, %v2861_v12  ;;  %v2563_v27 = vld [vmem:[%s4256_s2 + $0x50] sm:$0xff]  ;;  %v2955_v49 = vld [vmem:[%s3123_s17] sm:$0xff]  ;;  %v2566_v12 = vld [vmem:[%s4256_s2 + $0x68] sm:$0xff] }
 0x20b   : > { %1188 = vmatpush.msrb.mxu3 %v1142_v52  ;;  %v1138_v53 = vsel %vm507_vm2, %v3157_v24, %v2850_v42  ;;  %v1137_v63 = vsel %vm507_vm2, %v3157_v24, %v2851_v61  ;;  %v2588_v61 = vld [vmem:[%s4256_s2 + $0x98] sm:$0xff] }
 0x20c   : > { %2596 = vmatmul.msk.f32.gmra.mxu1 %vm1153_vm7, %v2588_v61 }
 0x20d   : > { %1189 = vmatpush.msrb.mxu3 %v1141_v56 }
 0x20f   : > { %v2854_v57 = vpop.permute.xlu0 %2853  ;;  %1190 = vmatpush.msrb.mxu3 %v1140_v50 }
 0x210   : > { %v3618_v21 = vpop.permute.xlu2 %2863  ;;  %v2855_v14 = vunpack.i.l.bf16 %v2854_v57  ;;  %v2856_v62 = vunpack.i.h.bf16 %v2854_v57 }
 0x211   : > { %1191 = vmatpush.msrb.mxu3 %v1139_v29  ;;  %v2865_v7 = vunpack.i.l.bf16 %v3618_v21  ;;  %v2866_v59 = vunpack.i.h.bf16 %v3618_v21 }
 0x212   : > { %v1428_v34 = vsel %vm690_vm4, %v2855_v14, %v3215_v58  ;;  %v1427_v25 = vsel %vm690_vm4, %v2856_v62, %v3215_v58  ;;  %v2603_v14 = vld [vmem:[%s4256_s2 + $0xd0] sm:$0xff] }
 0x213   : > { %1192 = vmatpush.msrb.mxu3 %v1138_v53  ;;  %v1542_v17 = vsel %vm791_vm6, %v2865_v7, %v3241_v13  ;;  %v1541_v46 = vsel %vm791_vm6, %v2866_v59, %v3241_v13  ;;  %v2591_v7 = vld [vmem:[%s4256_s2 + $0xb0] sm:$0xff]  ;;  %v2568_v59 = vld [vmem:[%s4256_s2 + $0x78] sm:$0xff] }
 0x214   : > { %v2567_v62 = vld [vmem:[%s4256_s2 + $0x70] sm:$0xff] }
 0x215   : > { %1193 = vmatpush.msrb.mxu3 %v1137_v63  ;;  %v1096_v63 = vld [vmem:[%s4256_s2] sm:$0xff] }
 0x216   : > { %2569 = vmatmul.msk.f32.vlgmr.msrb.gmra.mxu3 %vm1153_vm7, %v2561_v5 }
 0x217   : > { %v2879_v2 = vpop.permute.xlu1 %2878  ;;  %v2869_v38 = vpop.permute.xlu0 %2868 }
 0x218   : > { %v2881_v48 = vunpack.i.h.bf16 %v2879_v2  ;;  %v2880_v3 = vunpack.i.l.bf16 %v2879_v2  ;;  %v2871_v6 = vunpack.i.h.bf16 %v2869_v38  ;;  %v2870_v9 = vunpack.i.l.bf16 %v2869_v38  ;;  %v2889_v1 = vpop.permute.xlu2 %2888 }
 0x219   : > { %v2891_v11 = vunpack.i.h.bf16 %v2889_v1  ;;  %v2890_v41 = vunpack.i.l.bf16 %v2889_v1  ;;  %v2953_v1 = vld [vmem:[%s3123_s17 + $0x10] sm:$0xff] }
 0x21a   : > { %v1242_v44 = vsel %vm329_vm3, %v3173_v35, %v2880_v3  ;;  %v1430_v54 = vsel %vm690_vm4, %v2870_v9, %v3215_v58  ;;  %v1241_v0 = vsel %vm329_vm3, %v3173_v35, %v2881_v48  ;;  %v1429_v32 = vsel %vm690_vm4, %v2871_v6, %v3215_v58  ;;  %v2564_v48 = vld [vmem:[%s4256_s2 + $0x58] sm:$0xff]  ;;  %v2601_v3 = vld [vmem:[%s4256_s2 + $0xc0] sm:$0xff] }
 0x21b   : > { %1283 = vmatpush.msra.mxu0 %v1242_v44  ;;  %1471 = vmatpush.msra.mxu2 %v1430_v54  ;;  %v1544_v8 = vsel %vm791_vm6, %v2890_v41, %v3241_v13  ;;  %v1543_v40 = vsel %vm791_vm6, %v2891_v11, %v3241_v13  ;;  %v2952_v9 = vld [vmem:[%s3123_s17 + $0x18] sm:$0xff]  ;;  %v2602_v11 = vld [vmem:[%s4256_s2 + $0xc8] sm:$0xff]  ;;  %v1098_v54 = vld [vmem:[%s4256_s2 + $0x10] sm:$0xff] }
 0x21c   : > { %1585 = vmatpush.msra.mxu3 %v1544_v8  ;;  %v2954_v41 = vld [vmem:[%s3123_s17 + $0x8] sm:$0xff]  ;;  %v1099_v8 = vld [vmem:[%s4256_s2 + $0x18] sm:$0xff]  ;;  %s2972_s17 = scalar_lea.hbm %s2971_s8, 64 }
 0x21d   : > { %1284 = vmatpush.msra.mxu0 %v1241_v0  ;;  %1472 = vmatpush.msra.mxu2 %v1429_v32  ;;  %v2590_v44 = vld [vmem:[%s4256_s2 + $0xa8] sm:$0xff]  ;;  %v2604_v0 = vld [vmem:[%s4256_s2 + $0xd8] sm:$0xff]  ;;  %p2973_p11 = scmp.ne.s32.totalorder %s2971_s8, %s2972_s17 }
 0x21e   : > { %1586 = vmatpush.msra.mxu3 %v1543_v40  ;;  %v2592_v32 = vld [vmem:[%s4256_s2 + $0xb8] sm:$0xff]  ;;  %v2605_v40 = vld [vmem:[%s4256_s2 + $0xe0] sm:$0xff] }
 0x21f   : > { %2570 = vmatmul.msk.f32.gmra.mxu3 %vm1153_vm7, %v2562_v30  ;;  %v2884_v15 = vpop.permute.xlu1 %2883  ;;  %1285 = vmatpush.msra.mxu0 %v1240_v4  ;;  %v2874_v16 = vpop.permute.xlu0 %2873  ;;  %v1100_v30 = vld [vmem:[%s4256_s2 + $0x20] sm:$0xff]  ;;  %v1101_v4 = vld [vmem:[%s4256_s2 + $0x28] sm:$0xff]  ;;  %p2974_p12 = pnand %p2973_p11, %p3108_p5 }
 0x220   : > { %v2886_v19 = vunpack.i.h.bf16 %v2884_v15  ;;  %v2885_v20 = vunpack.i.l.bf16 %v2884_v15  ;;  %v2875_v22 = vunpack.i.l.bf16 %v2874_v16  ;;  %1473 = vmatpush.msra.mxu2 %v1428_v34  ;;  %v2894_v23 = vpop.permute.xlu2 %2893  ;;  %1587 = vmatpush.msra.mxu3 %v1542_v17  ;;  %v2876_v28 = vunpack.i.h.bf16 %v2874_v16  ;;  %v2606_v15 = vld [vmem:[%s4256_s2 + $0xe8] sm:$0xff]  ;;  %v2617_v16 = vld [vmem:[%s4256_s2 + $0x100] sm:$0xff]  ;;  %v1102_v34 = vld [vmem:[%s4256_s2 + $0x30] sm:$0xff] }
 0x221   : > { %v2896_v33 = vunpack.i.h.bf16 %v2894_v23  ;;  %v2895_v43 = vunpack.i.l.bf16 %v2894_v23  ;;  %1286 = vmatpush.msra.mxu0 %v1239_v18  ;;  %v2607_v17 = vld [vmem:[%s4256_s2 + $0xf0] sm:$0xff]  ;;  %v2618_v18 = vld [vmem:[%s4256_s2 + $0x108] sm:$0xff]  ;;  %v2620_v23 = vld [vmem:[%s4256_s2 + $0x118] sm:$0xff]  ;;  %p2975_p13 = pneg %p2974_p12 }
 0x222   : > { %1474 = vmatpush.msra.mxu2 %v1427_v25  ;;  %1588 = vmatpush.msra.mxu3 %v1541_v46  ;;  %v1238_v39 = vsel %vm329_vm3, %v3173_v35, %v2885_v20  ;;  %v1426_v45 = vsel %vm690_vm4, %v2875_v22, %v3215_v58  ;;  %v1237_v51 = vsel %vm329_vm3, %v3173_v35, %v2886_v19  ;;  %v1103_v19 = vld [vmem:[%s4256_s2 + $0x38] sm:$0xff]  ;;  %v2619_v22 = vld [vmem:[%s4256_s2 + $0x110] sm:$0xff]  ;;  %v2621_v25 = vld [vmem:[%s4256_s2 + $0x120] sm:$0xff] }
 0x223   : > { %1287 = vmatpush.msra.mxu0 %v1238_v39  ;;  %v1540_v47 = vsel %vm791_vm6, %v2895_v43, %v3241_v13  ;;  %v1425_v36 = vsel %vm690_vm4, %v2876_v28, %v3215_v58  ;;  %v1539_v37 = vsel %vm791_vm6, %v2896_v33, %v3241_v13  ;;  %v2608_v20 = vld [vmem:[%s4256_s2 + $0xf8] sm:$0xff]  ;;  %v2623_v28 = vld [vmem:[%s4256_s2 + $0x130] sm:$0xff] }
 0x224   : > { %1475 = vmatpush.msra.mxu2 %v1426_v45  ;;  %1589 = vmatpush.msra.mxu3 %v1540_v47  ;;  %v2624_v33 = vld [vmem:[%s4256_s2 + $0x138] sm:$0xff] }
 0x225   : > { %1288 = vmatpush.msra.mxu0 %v1237_v51 }
 0x226   : > { %1476 = vmatpush.msra.mxu2 %v1425_v36  ;;  %1590 = vmatpush.msra.mxu3 %v1539_v37 }
 0x227   : > { %2571 = vmatmul.msk.f32.gmra.mxu3 %vm1153_vm7, %v2563_v27  ;;  %v2904_v52 = vpop.permute.xlu1 %2903  ;;  %v2899_v55 = vpop.permute.xlu0 %2898 }
 0x228   : > { %v2906_v56 = vunpack.i.h.bf16 %v2904_v52  ;;  %v2905_v42 = vunpack.i.l.bf16 %v2904_v52  ;;  %v2901_v50 = vunpack.i.h.bf16 %v2899_v55  ;;  %v2900_v60 = vunpack.i.l.bf16 %v2899_v55  ;;  %v2909_v57 = vpop.permute.xlu2 %2908 }
 0x229   : > { %v2911_v21 = vunpack.i.h.bf16 %v2909_v57  ;;  %v2910_v29 = vunpack.i.l.bf16 %v2909_v57 }
 0x22a   : > { %v1236_v31 = vsel %vm329_vm3, %v3173_v35, %v2905_v42  ;;  %v1424_v53 = vsel %vm690_vm4, %v2900_v60, %v3215_v58  ;;  %v1235_v2 = vsel %vm329_vm3, %v3173_v35, %v2906_v56  ;;  %v1423_v38 = vsel %vm690_vm4, %v2901_v50, %v3215_v58  ;;  %v2589_v35 = vld [vmem:[%s4256_s2 + $0xa0] sm:$0xff] }
 0x22b   : > { %1289 = vmatpush.msra.mxu0 %v1236_v31  ;;  %1477 = vmatpush.msra.mxu2 %v1424_v53  ;;  %v1538_v5 = vsel %vm791_vm6, %v2910_v29, %v3241_v13  ;;  %v1537_v6 = vsel %vm791_vm6, %v2911_v21, %v3241_v13  ;;  %v1097_v13 = vld [vmem:[%s4256_s2 + $0x8] sm:$0xff] }
 0x22c   : > { %1591 = vmatpush.msra.mxu3 %v1538_v5  ;;  %2597 = vmatmul.msk.f32.gmra.mxu1 %vm1153_vm7, %v2589_v35 }
 0x22d   : > { %1290 = vmatpush.msra.mxu0 %v1235_v2  ;;  %1478 = vmatpush.msra.mxu2 %v1423_v38 }
 0x22e   : > { %1592 = vmatpush.msra.mxu3 %v1537_v6  ;;  %2577 = vmatmul.msk.f32.vlgmr.msra.gmra.mxu0 %vm1153_vm7, %v1096_v63 }
 0x22f   : > { %2572 = vmatmul.msk.f32.gmra.mxu3 %vm1153_vm7, %v2564_v48  ;;  %2609 = vmatmul.msk.f32.vlgmr.msra.gmra.mxu2 %vm1153_vm7, %v2601_v3  ;;  %v1629_v36 = vpop.permute.xlu0 %1628  ;;  %v1634_v29 = vpop.permute.xlu1 %1633 }
 0x230   : > { %2189 = vmatpush.msrb.mxu3 %v2952_v9  ;;  %v1366_v47 = vpop.f32.mrf.mxu1  ;;  %v1639_v50 = vpop.permute.xlu2 %1638 }
 0x232   : > { %2190 = vmatpush.msrb.mxu3 %v2953_v1 }
 0x234   : > { %2191 = vmatpush.msrb.mxu3 %v2954_v41  ;;  %2598 = vmatmul.msk.f32.gmra.mxu1 %vm1153_vm7, %v2590_v44 }
 0x236   : > { %2578 = vmatmul.msk.f32.gmra.mxu0 %vm1153_vm7, %v1097_v13  ;;  %2192 = vmatpush.msrb.mxu3 %v2955_v49 }
 0x237   : > { %2573 = vmatmul.msk.f32.gmra.mxu3 %vm1153_vm7, %v2565_v10  ;;  %2610 = vmatmul.msk.f32.gmra.mxu2 %vm1153_vm7, %v2602_v11  ;;  %v1644_v42 = vpop.permute.xlu0 %1643  ;;  %v3854_v48 = vpop.permute.xlu1 %1648 }
 0x238   : > { %v3844_v61 = vpop.permute.xlu2 %1653  ;;  %v1369_v5 = vpop.f32.mrf.mxu1 }
 0x23c   : > { %2599 = vmatmul.msk.f32.gmra.mxu1 %vm1153_vm7, %v2591_v7 }
 0x23e   : > { %2579 = vmatmul.msk.f32.gmra.mxu0 %vm1153_vm7, %v1098_v54 }
 0x23f   : > { %2574 = vmatmul.msk.f32.gmra.mxu3 %vm1153_vm7, %v2566_v12  ;;  %2611 = vmatmul.msk.f32.gmra.mxu2 %vm1153_vm7, %v2603_v14  ;;  %v3842_v57 = vpop.permute.xlu0 %1658  ;;  %v3858_v41 = vpop.permute.xlu1 %1663 }
 0x240   : > { %v3850_v63 = vpop.permute.xlu2 %1711 }
 0x244   : > { %2600 = vmatmul.msk.f32.gmra.mxu1 %vm1153_vm7, %v2592_v32 }
 0x246   : > { %2580 = vmatmul.msk.f32.gmra.mxu0 %vm1153_vm7, %v1099_v8 }
 0x247   : > { %2575 = vmatmul.msk.f32.gmra.mxu3 %vm1153_vm7, %v2567_v62  ;;  %2612 = vmatmul.msk.f32.gmra.mxu2 %vm1153_vm7, %v2604_v0  ;;  %v3848_v53 = vpop.permute.xlu0 %1706 }
 0x248   : > { %v3856_v10 = vpop.permute.xlu2 %1696 }
 0x24e   : > { %2581 = vmatmul.msk.f32.gmra.mxu0 %vm1153_vm7, %v1100_v30 }
 0x24f   : > { %2576 = vmatmul.msk.f32.gmra.mxu3 %vm1153_vm7, %v2568_v59  ;;  %2613 = vmatmul.msk.f32.gmra.mxu2 %vm1153_vm7, %v2605_v40  ;;  %v1692_v6 = vpop.permute.xlu0 %1691 }
 0x250   : > { %v1682_v59 = vpop.permute.xlu2 %1681 }
 0x256   : > { %2582 = vmatmul.msk.f32.gmra.mxu0 %vm1153_vm7, %v1101_v4 }
 0x257   : > { %2614 = vmatmul.msk.f32.gmra.mxu2 %vm1153_vm7, %v2606_v15  ;;  %2625 = vmatmul.msk.f32.vlgmr.msra.gmra.mxu3 %vm1153_vm7, %v2617_v16  ;;  %v1677_v8 = vpop.permute.xlu0 %1676  ;;  %v1702_v15 = vpop.permute.xlu1 %1701 }
 0x25e   : > { %2583 = vmatmul.msk.f32.gmra.mxu0 %vm1153_vm7, %v1102_v34 }
 0x25f   : > { %2615 = vmatmul.msk.f32.gmra.mxu2 %vm1153_vm7, %v2607_v17  ;;  %2626 = vmatmul.msk.f32.gmra.mxu3 %vm1153_vm7, %v2618_v18 }
 0x266   : > { %2584 = vmatmul.msk.f32.gmra.mxu0 %vm1153_vm7, %v1103_v19 }
 0x267   : > { %2616 = vmatmul.msk.f32.gmra.mxu2 %vm1153_vm7, %v2608_v20  ;;  %2627 = vmatmul.msk.f32.gmra.mxu3 %vm1153_vm7, %v2619_v22 }
 0x26f   : > { %2628 = vmatmul.msk.f32.gmra.mxu3 %vm1153_vm7, %v2620_v23  ;;  %v2145_v23 = vld [vmem:[%s4258_s4] sm:$0xff] }
 0x274   : > { %v1372_v35 = vpop.f32.mrf.mxu1 }
 0x277   : > { %2629 = vmatmul.msk.f32.gmra.mxu3 %vm1153_vm7, %v2621_v25 }
 0x27f   : > { %2630 = vmatmul.msk.f32.gmra.mxu3 %vm1153_vm7, %v2622_v26 }
 0x287   : > { %2631 = vmatmul.msk.f32.gmra.mxu3 %vm1153_vm7, %v2623_v28 }
 0x289   : > { %v1375_v62 = vpop.f32.mrf.mxu1 }
 0x28f   : > { %2632 = vmatmul.msk.f32.gmra.mxu3 %vm1153_vm7, %v2624_v33 }
 0x297   : > { %2689 = vmatmul.msk.f32.vlgmr.msrb.gmra.mxu3 %vm338_vm1, %v2145_v23 }
 0x299   : > { %v1195_v43 = vpop.f32.mrf.mxu3 }
 0x2a2   : > { %v1198_v46 = vpop.f32.mrf.mxu3 }
 0x2a9   : > { %v1378_v28 = vpop.f32.mrf.mxu1 }
 0x2aa   : > { %v1201_v39 = vpop.f32.mrf.mxu3 }
 0x2ab   : > { %v1292_v45 = vpop.f32.mrf.mxu0 }
 0x2ac   : > { %v1293_v51 = vadd.f32 %v1292_v45, %v1195_v43 }
 0x2ae   : > { %v1390_v27 = vadd.f32 %v1366_v47, %v1293_v51  ;;  %v2146_v51 = vld [vmem:[%s4258_s4 + $0x8] sm:$0xff] }
 0x2af   : > { %2690 = vmatmul.msk.f32.gmra.mxu3 %vm338_vm1, %v2146_v51 }
 0x2b2   : > { %v1204_v37 = vpop.f32.mrf.mxu3  ;;  %v1480_v52 = vpop.f32.mrf.mxu2 }
 0x2b3   : > { %v1504_v55 = vadd.f32 %v1480_v52, %v1390_v27  ;;  %v1295_v31 = vpop.f32.mrf.mxu0  ;;  %v1687_v27 = vpop.permute.xlu1 %1686 }
 0x2b4   : > { %v1296_v1 = vadd.f32 %v1295_v31, %v1198_v46  ;;  %v1381_v31 = vpop.f32.mrf.mxu1 }
 0x2b6   : > { %v1391_v49 = vadd.f32 %v1369_v5, %v1296_v1 }
 0x2ba   : > { %v1207_v56 = vpop.f32.mrf.mxu3  ;;  %v1483_v2 = vpop.f32.mrf.mxu2 }
 0x2bb   : > { %v1298_v3 = vpop.f32.mrf.mxu0  ;;  %v1505_v54 = vadd.f32 %v1483_v2, %v1391_v49 }
 0x2bc   : > { %v1299_v0 = vadd.f32 %v1298_v3, %v1201_v39 }
 0x2be   : > { %v1392_v16 = vadd.f32 %v1372_v35, %v1299_v0 }
 0x2c2   : > { %v3840_v60 = vpop.f32.mrf.mxu3  ;;  %v1486_v11 = vpop.f32.mrf.mxu2 }
 0x2c3   : > { %v1301_v44 = vpop.f32.mrf.mxu0  ;;  %v1506_v20 = vadd.f32 %v1486_v11, %v1392_v16 }
 0x2c4   : > { %v1302_v22 = vadd.f32 %v1301_v44, %v1204_v37 }
 0x2c6   : > { %v1393_v33 = vadd.f32 %v1375_v62, %v1302_v22 }
 0x2ca   : > { %v3846_v21 = vpop.f32.mrf.mxu3  ;;  %v1489_v40 = vpop.f32.mrf.mxu2 }
 0x2cb   : > { %v1304_v18 = vpop.f32.mrf.mxu0  ;;  %v1507_v46 = vadd.f32 %v1489_v40, %v1393_v33 }
 0x2cc   : > { %v1305_v37 = vadd.f32 %v1304_v18, %v1207_v56  ;;  %v2147_v56 = vld [vmem:[%s4258_s4 + $0x10] sm:$0xff] }
 0x2cd   : > { %2691 = vmatmul.msk.f32.gmra.mxu3 %vm338_vm1, %v2147_v56  ;;  %v2708_v56 = vld [vmem:[%s4260_s6 + $0xd8] sm:$0xff] }
 0x2ce   : > { %v1394_v5 = vadd.f32 %v1378_v28, %v1305_v37  ;;  %v2642_v37 = vld [vmem:[%s4260_s6 + $0x88] sm:$0xff] }
 0x2d2   : > { %v3852_v38 = vpop.f32.mrf.mxu3  ;;  %v1492_v43 = vpop.f32.mrf.mxu2 }
 0x2da   : > { %v1594_v9 = vpop.f32.mrf.mxu3  ;;  %v1495_v3 = vpop.f32.mrf.mxu2 }
 0x2db   : > { %v1618_v13 = vadd.f32 %v1594_v9, %v1504_v55  ;;  %v1508_v9 = vadd.f32 %v1492_v43, %v1394_v5  ;;  %v2150_v43 = vld [vmem:[%s4258_s4 + $0x28] sm:$0xff]  ;;  %v2644_v5 = vld [vmem:[%s4260_s6 + $0x98] sm:$0xff] }
 0x2dd   : > { %v1666_v12 = vmul.f32 %v1629_v36, %v1618_v13  ;;  %v1307_v36 = vpop.f32.mrf.mxu0 }
 0x2de   : > { %v1308_v1 = vadd.f32 %v1307_v36, %v3840_v60  ;;  %v2148_v60 = vld [vmem:[%s4258_s4 + $0x18] sm:$0xff]  ;;  %v2639_v36 = vld [vmem:[%s4259_s5 + $0xb0] sm:$0xff] }
 0x2df   : > { %v3860_v30 = vadd.f32 %v1677_v8, %v1666_v12  ;;  %2692 = vmatmul.msk.f32.gmra.mxu3 %vm338_vm1, %v2148_v60 }
 0x2e0   : > { %v1395_v11 = vadd.f32 %v1381_v31, %v1308_v1  ;;  %v2699_v31 = vld [vmem:[%s4259_s5 + $0xd0] sm:$0xff]  ;;  %v2698_v1 = vld [vmem:[%s4259_s5 + $0xc8] sm:$0xff] }
 0x2e1   : > { %v1722_v17 = vmax.f32 %v3860_v30, 0.0  ;;  %v2635_v30 = vld [vmem:[%s4259_s5 + $0x90] sm:$0xff] }
 0x2e2   : > { %v1597_v14 = vpop.f32.mrf.mxu3  ;;  %v1509_v49 = vadd.f32 %v1495_v3, %v1395_v11  ;;  %v2647_v3 = vld [vmem:[%s4260_s6 + $0xb0] sm:$0xff] }
 0x2e3   : > { %v1619_v7 = vadd.f32 %v1597_v14, %v1505_v54  ;;  %v1384_v54 = vpop.f32.mrf.mxu1  ;;  %v2711_v11 = vld [vmem:[%s4260_s6 + $0xf0] sm:$0xff] }
 0x2e5   : > { %v1667_v32 = vmul.f32 %v1634_v29, %v1619_v7  ;;  %v1498_v7 = vpop.f32.mrf.mxu2 }
 0x2e7   : > { %v3862_v4 = vadd.f32 %v1682_v59, %v1667_v32 }
 0x2e9   : > { %v1723_v34 = vmax.f32 %v3862_v4, 0.0  ;;  %v2634_v4 = vld [vmem:[%s4259_s5 + $0x88] sm:$0xff] }
 0x2ea   : > { %v1600_v19 = vpop.f32.mrf.mxu3 }
 0x2eb   : > { %v3873_v25 = vpack.i.bf16 %v1722_v17, %v1723_v34  ;;  %v1620_v26 = vadd.f32 %v1600_v19, %v1506_v20  ;;  %v2149_v19 = vld [vmem:[%s4258_s4 + $0x20] sm:$0xff]  ;;  %v1387_v23 = vpop.f32.mrf.mxu1 }
 0x2ec   : > { %2693 = vmatmul.msk.f32.gmra.mxu3 %vm338_vm1, %v2149_v19 }
 0x2ed   : > { %v1668_v39 = vmul.f32 %v1639_v50, %v1620_v26 }
 0x2ef   : > { %v3880_v52 = vadd.f32 %v1687_v27, %v1668_v39 }
 0x2f1   : > { %v1724_v50 = vmax.f32 %v3880_v52, 0.0  ;;  %v2648_v52 = vld [vmem:[%s4260_s6 + $0xb8] sm:$0xff] }
 0x2f2   : > { %v1603_v45 = vpop.f32.mrf.mxu3 }
 0x2f3   : > { %v1621_v47 = vadd.f32 %v1603_v45, %v1507_v46 }
 0x2f4   : > { %2694 = vmatmul.msk.f32.gmra.mxu3 %vm338_vm1, %v2150_v43  ;;  %v2651_v43 = vld [vmem:[%s4257_s3 + $0x50] sm:$0xff] }
 0x2f5   : > { %v1669_v55 = vmul.f32 %v1644_v42, %v1621_v47 }
 0x2f7   : > { %v3882_v29 = vadd.f32 %v1692_v6, %v1669_v55  ;;  %v1310_v6 = vpop.f32.mrf.mxu0  ;;  %v2641_v55 = vld [vmem:[%s4260_s6 + $0x80] sm:$0xff] }
 0x2f8   : > { %v1311_v8 = vadd.f32 %v1310_v6, %v3846_v21  ;;  %v2700_v6 = vld [vmem:[%s4259_s5 + $0xd8] sm:$0xff] }
 0x2f9   : > { %v1725_v2 = vmax.f32 %v3882_v29, 0.0  ;;  %v2640_v29 = vld [vmem:[%s4259_s5 + $0xb8] sm:$0xff] }
 0x2fa   : > { %v1606_v35 = vpop.f32.mrf.mxu3  ;;  %v1396_v40 = vadd.f32 %v1384_v54, %v1311_v8  ;;  %v2707_v54 = vld [vmem:[%s4260_s6 + $0xd0] sm:$0xff] }
 0x2fb   : > { %v2937_v13 = vpack.i.bf16 %v1724_v50, %v1725_v2  ;;  %v1622_v42 = vadd.f32 %v1606_v35, %v1508_v9  ;;  %v2646_v35 = vld [vmem:[%s4260_s6 + $0xa8] sm:$0xff]  ;;  %v2705_v9 = vld [vmem:[%s4260_s6 + $0xc0] sm:$0xff] }
 0x2fc   : > { %v1510_v20 = vadd.f32 %v1498_v7, %v1396_v40  ;;  %v2649_v40 = vld [vmem:[%s4257_s3 + $0x40] sm:$0xff] }
 0x2fd   : > { %v1670_v44 = vmul.f32 %v3854_v48, %v1622_v42  ;;  %v2701_v42 = vld [vmem:[%s4259_s5 + $0xe0] sm:$0xff] }
 0x2ff   : > { %v1718_v62 = vadd.f32 %v3856_v10, %v1670_v44  ;;  %v1313_v59 = vpop.f32.mrf.mxu0  ;;  %v2703_v44 = vld [vmem:[%s4259_s5 + $0xf0] sm:$0xff] }
 0x300   : > { %v1314_v22 = vadd.f32 %v1313_v59, %v3852_v38  ;;  %v2712_v59 = vld [vmem:[%s4260_s6 + $0xf8] sm:$0xff] }
 0x301   : > { %v1726_v48 = vmax.f32 %v1718_v62, 0.0  ;;  %v2710_v62 = vld [vmem:[%s4260_s6 + $0xe8] sm:$0xff] }
 0x302   : > { %v1609_v12 = vpop.f32.mrf.mxu3 }
 0x303   : > { %v1623_v14 = vadd.f32 %v1609_v12, %v1509_v49  ;;  %v2704_v49 = vld [vmem:[%s4259_s5 + $0xf8] sm:$0xff]  ;;  %v2706_v12 = vld [vmem:[%s4260_s6 + $0xc8] sm:$0xff] }
 0x305   : > { %v1671_v0 = vmul.f32 %v3844_v61, %v1623_v14  ;;  %v1501_v61 = vpop.f32.mrf.mxu2 }
 0x307   : > { %v1719_v32 = vadd.f32 %v1702_v15, %v1671_v0  ;;  %v1397_v15 = vadd.f32 %v1387_v23, %v1314_v22  ;;  %v2709_v0 = vld [vmem:[%s4260_s6 + $0xe0] sm:$0xff] }
 0x309   : > { %v1727_v16 = vmax.f32 %v1719_v32, 0.0  ;;  %v1511_v26 = vadd.f32 %v1501_v61, %v1397_v15 }
 0x30a   : > { %v1612_v18 = vpop.f32.mrf.mxu3 }
 0x30b   : > { %v2912_v21 = vpack.i.bf16 %v1726_v48, %v1727_v16  ;;  %v1624_v10 = vadd.f32 %v1612_v18, %v1510_v20  ;;  %v2650_v18 = vld [vmem:[%s4257_s3 + $0x48] sm:$0xff] }
 0x30d   : > { %2913 = vrot.lane.b32.xlu0 %v2912_v21, %s3024_s21  ;;  %v1672_v28 = vmul.f32 %v3842_v57, %v1624_v10  ;;  %v2633_v57 = vld [vmem:[%s4259_s5 + $0x80] sm:$0xff] }
 0x30f   : > { %v1720_v38 = vadd.f32 %v3848_v53, %v1672_v28  ;;  %v2151_v53 = vld [vmem:[%s4258_s4 + $0x30] sm:$0xff] }
 0x310   : > { %2695 = vmatmul.msk.f32.gmra.mxu3 %vm338_vm1, %v2151_v53 }
 0x311   : > { %v1728_v47 = vmax.f32 %v1720_v38, 0.0 }
 0x312   : > { %v1615_v33 = vpop.f32.mrf.mxu3 }
 0x313   : > { %v1625_v46 = vadd.f32 %v1615_v33, %v1511_v26 }
 0x315   : > { %v1673_v39 = vmul.f32 %v3858_v41, %v1625_v46  ;;  %2938 = vrot.lane.b32.xlu0 %v2937_v13, %s3021_s18  ;;  %v2152_v41 = vld [vmem:[%s4258_s4 + $0x38] sm:$0xff] }
 0x317   : > { %v1721_v45 = vadd.f32 %v3850_v63, %v1673_v39  ;;  %v2636_v63 = vld [vmem:[%s4259_s5 + $0x98] sm:$0xff] }
 0x318   : > { %2696 = vmatmul.msk.f32.gmra.mxu3 %vm338_vm1, %v2152_v41 }
 0x319   : > { %v1729_v51 = vmax.f32 %v1721_v45, 0.0 }
 0x31b   : > { %1797 = vmatpush.msrb.mxu0 %v1729_v51  ;;  %v2927_v27 = vpack.i.bf16 %v1728_v47, %v1729_v51 }
 0x31d   : > { %2051 = vperm.xlu0 %2829, %v2633_v57   ;;  %2928 = vrot.lane.b32.xlu2 %v2927_v27, %s3021_s18 }
 0x31e   : > { %2918 = vrot.lane.b32.xlu1 %v2927_v27, %s3024_s21  ;;  %1798 = vmatpush.msrb.mxu0 %v1728_v47 }
 0x320   : > { %1799 = vmatpush.msrb.mxu0 %v1727_v16 }
 0x322   : > { %1800 = vmatpush.msrb.mxu0 %v1726_v48 }
 0x324   : > { %1801 = vmatpush.msrb.mxu0 %v1725_v2  ;;  %v2702_v2 = vld [vmem:[%s4259_s5 + $0xe8] sm:$0xff] }
 0x325   : > { %2066 = vperm.xlu0 %2829, %v2636_v63   ;;  %2933 = vrot.lane.b32.xlu2 %v2937_v13, %s3024_s21  ;;  %v2697_v13 = vld [vmem:[%s4259_s5 + $0xc0] sm:$0xff] }
 0x326   : > { %2923 = vrot.lane.b32.xlu1 %v2912_v21, %s3021_s18  ;;  %1802 = vmatpush.msrb.mxu0 %v1724_v50  ;;  %v2643_v50 = vld [vmem:[%s4260_s6 + $0x90] sm:$0xff] }
 0x328   : > { %1803 = vmatpush.msrb.mxu0 %v1723_v34  ;;  %v2645_v34 = vld [vmem:[%s4260_s6 + $0xa0] sm:$0xff] }
 0x32a   : > { %1804 = vmatpush.msrb.mxu0 %v1722_v17  ;;  %v2638_v17 = vld [vmem:[%s4259_s5 + $0xa8] sm:$0xff] }
 0x32b   : > { %2657 = vmatmul.msk.f32.vlgmr.msrb.gmra.mxu0 %vm1153_vm7, %v2649_v40 }
 0x32d   : > { %2081 = vperm.xlu0 %2829, %v2639_v36   ;;  %2948 = vrot.lane.b32.xlu2 %v3873_v25, %s3021_s18  ;;  %s2976_s18 = scalar_lea.hbm %s4261_s7, 128 }
 0x32e   : > { %2943 = vrot.lane.b32.xlu1 %v3873_v25, %s3024_s21  ;;  %v2637_v25 = vld [vmem:[%s4259_s5 + $0xa0] sm:$0xff]  ;;  %s269_s21 = sand.u32 1, %s3010_s25   ;;  %p2978_p1 = scmp.lt.s32.totalorder %s2976_s18, %s2972_s17 }
 0x32f   : > { %s2438_s14 = sshll.u32 %s269_s21, 6  ;;  %s2357_s29 = scalar_lea.sflag [#allocation3], %s269_s21 }
 0x330   : > { %s4195_s15 = scalar_lea.vmem [#allocation2], %s2438_s14  ;;  %p2979_p2 = por %p2978_p1, %p2977_p0 }
 0x331   : > { %s2369_s28 = sshll.u32 %s4195_s15, 4  ;;  %s2370_s28 = int_to_ptr.vmem [resolvable:$true] %s2369_s28 }
 0x332   : > { %p2980_p3 = pnand %p2979_p2, %p2975_p13 }
 0x333   : > { %2658 = vmatmul.msk.f32.gmra.mxu0 %vm1153_vm7, %v2650_v18 }
 0x335   : > { %2104 = vperm.xlu0 %2829, %v2642_v37   ;;  %2061 = vperm.xlu2 %2831, %v2635_v30  }
 0x336   : > { %2056 = vperm.xlu1 %2830, %v2634_v4   ;;  %v2652_v4 = vld [vmem:[%s4257_s3 + $0x58] sm:$0xff] }
 0x33b   : > { %2659 = vmatmul.msk.f32.gmra.mxu0 %vm1153_vm7, %v2651_v43 }
 0x33d   : > { %2119 = vperm.xlu0 %2829, %v2645_v34   ;;  %2076 = vperm.xlu2 %2831, %v2638_v17  }
 0x33e   : > { %2071 = vperm.xlu1 %2830, %v2637_v25  }
 0x343   : > { %2660 = vmatmul.msk.f32.gmra.mxu0 %vm1153_vm7, %v2652_v4 }
 0x345   : > { %2134 = vperm.xlu0 %2829, %v2648_v52   ;;  %2099 = vperm.xlu2 %2831, %v2641_v55  }
 0x346   : > { %2086 = vperm.xlu1 %2830, %v2640_v29  }
 0x34d   : > { %2239 = vperm.xlu0 %2829, %v2699_v31   ;;  %2114 = vperm.xlu2 %2831, %v2644_v5   ;;  %v2673_v31 = vld [vmem:[%s4257_s3 + $0x80] sm:$0xff] }
 0x34e   : > { %2109 = vperm.xlu1 %2830, %v2643_v50   ;;  %v1748_v5 = vld [vmem:[%s4257_s3] sm:$0xff] }
 0x355   : > { %2254 = vperm.xlu0 %2829, %v2702_v2   ;;  %2129 = vperm.xlu2 %2831, %v2647_v3   ;;  %v2653_v3 = vld [vmem:[%s4257_s3 + $0x60] sm:$0xff] }
 0x356   : > { %2124 = vperm.xlu1 %2830, %v2646_v35   ;;  %2661 = vmatmul.msk.f32.gmra.mxu0 %vm1153_vm7, %v2653_v3  ;;  %v2674_v35 = vld [vmem:[%s4257_s3 + $0x88] sm:$0xff] }
 0x35d   : > { %2286 = vperm.xlu0 %2829, %v2705_v9   ;;  %2234 = vperm.xlu2 %2831, %v2698_v1   ;;  %v2675_v9 = vld [vmem:[%s4257_s3 + $0x90] sm:$0xff] }
 0x35e   : > { %2229 = vperm.xlu1 %2830, %v2697_v13   ;;  %v1750_v1 = vld [vmem:[%s4257_s3 + $0x10] sm:$0xff] }
 0x35f   : > { %v2655_v13 = vld [vmem:[%s4257_s3 + $0x70] sm:$0xff] }
 0x365   : > { %2301 = vperm.xlu0 %2829, %v2708_v56   ;;  %2249 = vperm.xlu2 %2831, %v2701_v42   ;;  %v2676_v56 = vld [vmem:[%s4257_s3 + $0x98] sm:$0xff] }
 0x366   : > { %2244 = vperm.xlu1 %2830, %v2700_v6   ;;  %v1751_v42 = vld [vmem:[%s4257_s3 + $0x18] sm:$0xff] }
 0x367   : > { %v2656_v6 = vld [vmem:[%s4257_s3 + $0x78] sm:$0xff] }
 0x36d   : > { %2316 = vperm.xlu0 %2829, %v2711_v11   ;;  %2264 = vperm.xlu2 %2831, %v2704_v49   ;;  %v2677_v11 = vld [vmem:[%s4257_s3 + $0xa0] sm:$0xff] }
 0x36e   : > { %2259 = vperm.xlu1 %2830, %v2703_v44   ;;  %v1752_v49 = vld [vmem:[%s4257_s3 + $0x20] sm:$0xff]  ;;  %v2678_v44 = vld [vmem:[%s4257_s3 + $0xa8] sm:$0xff] }
 0x375   : > { %2296 = vperm.xlu2 %2831, %v2707_v54   ;;  %v1753_v54 = vld [vmem:[%s4257_s3 + $0x28] sm:$0xff] }
 0x376   : > { %2291 = vperm.xlu1 %2830, %v2706_v12   ;;  %v2679_v12 = vld [vmem:[%s4257_s3 + $0xb0] sm:$0xff] }
 0x377   : > { %v2929_v14 = vpop.permute.xlu2 %2928 }
 0x378   : > { %v2931_v7 = vunpack.i.h.bf16 %v2929_v14  ;;  %v2930_v60 = vunpack.i.l.bf16 %v2929_v14  ;;  %v1754_v14 = vld [vmem:[%s4257_s3 + $0x30] sm:$0xff] }
 0x37a   : > { %v1861_v8 = vsel %vm507_vm2, %v3157_v24, %v2930_v60  ;;  %v1860_v32 = vsel %vm507_vm2, %v3157_v24, %v2931_v7  ;;  %v2680_v7 = vld [vmem:[%s4257_s3 + $0xb8] sm:$0xff] }
 0x37b   : > { %1902 = vmatpush.msrb.mxu1 %v1861_v8  ;;  %v1755_v60 = vld [vmem:[%s4257_s3 + $0x38] sm:$0xff] }
 0x37d   : > { %2311 = vperm.xlu2 %2831, %v2710_v62   ;;  %1903 = vmatpush.msrb.mxu1 %v1860_v32 }
 0x37e   : > { %2306 = vperm.xlu1 %2830, %v2709_v0  }
 0x37f   : > { %v2914_v48 = vpop.permute.xlu0 %2913  ;;  %v2934_v22 = vpop.permute.xlu2 %2933 }
 0x380   : > { %v2915_v21 = vunpack.i.l.bf16 %v2914_v48  ;;  %v2916_v10 = vunpack.i.h.bf16 %v2914_v48  ;;  %v2935_v15 = vunpack.i.l.bf16 %v2934_v22  ;;  %v2936_v46 = vunpack.i.h.bf16 %v2934_v22 }
 0x382   : > { %v1965_v26 = vsel %vm690_vm4, %v2915_v21, %v3215_v58  ;;  %v1964_v45 = vsel %vm690_vm4, %v2916_v10, %v3215_v58  ;;  %v1963_v57 = vsel %vm690_vm4, %v2935_v15, %v3215_v58  ;;  %v1962_v41 = vsel %vm690_vm4, %v2936_v46, %v3215_v58 }
 0x386   : > { %2321 = vperm.xlu1 %2830, %v2712_v59  }
 0x387   : > { %v2939_v28 = vpop.permute.xlu0 %2938  ;;  %v2949_v27 = vpop.permute.xlu2 %2948 }
 0x388   : > { %v2940_v47 = vunpack.i.l.bf16 %v2939_v28  ;;  %v2941_v53 = vunpack.i.h.bf16 %v2939_v28  ;;  %v2950_v36 = vunpack.i.l.bf16 %v2949_v27  ;;  %v2951_v34 = vunpack.i.h.bf16 %v2949_v27 }
 0x38a   : > { %v1857_v37 = vsel %vm507_vm2, %v3157_v24, %v2940_v47  ;;  %v1856_v52 = vsel %vm507_vm2, %v3157_v24, %v2941_v53  ;;  %v1855_v55 = vsel %vm507_vm2, %v3157_v24, %v2950_v36  ;;  %v1854_v50 = vsel %vm507_vm2, %v3157_v24, %v2951_v34 }
 0x38f   : > { %v2052_v8 = vpop.permute.xlu0 %2051  ;;  %v4164_v32 = vpop.permute.xlu2 %2061 }
 0x390   : > { %v2919_v16 = vpop.permute.xlu1 %2918 }
 0x391   : > { %v2921_v19 = vunpack.i.h.bf16 %v2919_v16  ;;  %v2920_v20 = vunpack.i.l.bf16 %v2919_v16 }
 0x393   : > { %v1967_v23 = vsel %vm690_vm4, %v2920_v20, %v3215_v58  ;;  %v1966_v61 = vsel %vm690_vm4, %v2921_v19, %v3215_v58 }
 0x394   : > { %2008 = vmatpush.msrb.mxu2 %v1967_v23 }
 0x396   : > { %2009 = vmatpush.msrb.mxu2 %v1966_v61 }
 0x397   : > { %v4162_v0 = vpop.permute.xlu0 %2066  ;;  %v4170_v48 = vpop.permute.xlu2 %2076 }
 0x398   : > { %v2924_v33 = vpop.permute.xlu1 %2923  ;;  %2010 = vmatpush.msrb.mxu2 %v1965_v26 }
 0x399   : > { %v2926_v38 = vunpack.i.h.bf16 %v2924_v33  ;;  %v2925_v39 = vunpack.i.l.bf16 %v2924_v33  ;;  %v2194_v33 = vpop.f32.mrf.mxu3 }
 0x39a   : > { %2011 = vmatpush.msrb.mxu2 %v1964_v45 }
 0x39b   : > { %v1859_v51 = vsel %vm507_vm2, %v3157_v24, %v2925_v39  ;;  %v1858_v63 = vsel %vm507_vm2, %v3157_v24, %v2926_v38  ;;  %v1749_v24 = vld [vmem:[%s4257_s3 + $0x8] sm:$0xff] }
 0x39c   : > { %1904 = vmatpush.msrb.mxu1 %v1859_v51  ;;  %2012 = vmatpush.msrb.mxu2 %v1963_v57 }
 0x39e   : > { %1905 = vmatpush.msrb.mxu1 %v1858_v63  ;;  %2013 = vmatpush.msrb.mxu2 %v1962_v41 }
 0x39f   : > { %v4168_v40 = vpop.permute.xlu0 %2081  ;;  %v2100_v19 = vpop.permute.xlu2 %2099 }
 0x3a0   : > { %v2944_v30 = vpop.permute.xlu1 %2943  ;;  %1906 = vmatpush.msrb.mxu1 %v1857_v37 }
 0x3a1   : > { %v2946_v17 = vunpack.i.h.bf16 %v2944_v30  ;;  %v2945_v25 = vunpack.i.l.bf16 %v2944_v30  ;;  %v2197_v47 = vpop.f32.mrf.mxu3 }
 0x3a2   : > { %1907 = vmatpush.msrb.mxu1 %v1856_v52 }
 0x3a3   : > { %v1961_v29 = vsel %vm690_vm4, %v2945_v25, %v3215_v58  ;;  %v1960_v2 = vsel %vm690_vm4, %v2946_v17, %v3215_v58  ;;  %v2654_v58 = vld [vmem:[%s4257_s3 + $0x68] sm:$0xff] }
 0x3a4   : > { %1908 = vmatpush.msrb.mxu1 %v1855_v55  ;;  %2014 = vmatpush.msrb.mxu2 %v1961_v29 }
 0x3a5   : > { %2662 = vmatmul.msk.f32.gmra.mxu0 %vm1153_vm7, %v2654_v58 }
 0x3a6   : > { %1909 = vmatpush.msrb.mxu1 %v1854_v50  ;;  %2015 = vmatpush.msrb.mxu2 %v1960_v2 }
 0x3a7   : > { %2681 = vmatmul.msk.f32.vlgmr.msrb.gmra.mxu2 %vm1153_vm7, %v2673_v31  ;;  %2665 = vmatmul.msk.f32.vlgmr.msrb.gmra.mxu1 %vm1153_vm7, %v1748_v5  ;;  %v2105_v18 = vpop.permute.xlu0 %2104  ;;  %v4176_v21 = vpop.permute.xlu2 %2114 }
 0x3a8   : > { %v2057_v62 = vpop.permute.xlu1 %2056  ;;  %v1806_v26 = vpop.f32.mrf.mxu0 }
 0x3a9   : > { %v2200_v52 = vpop.f32.mrf.mxu3 }
 0x3ad   : > { %2663 = vmatmul.msk.f32.gmra.mxu0 %vm1153_vm7, %v2655_v13 }
 0x3af   : > { %2682 = vmatmul.msk.f32.gmra.mxu2 %vm1153_vm7, %v2674_v35  ;;  %2666 = vmatmul.msk.f32.gmra.mxu1 %vm1153_vm7, %v1749_v24  ;;  %v4174_v22 = vpop.permute.xlu0 %2119  ;;  %v4182_v61 = vpop.permute.xlu2 %2129 }
 0x3b0   : > { %v4166_v59 = vpop.permute.xlu1 %2071  ;;  %v1809_v38 = vpop.f32.mrf.mxu0 }
 0x3b5   : > { %2664 = vmatmul.msk.f32.gmra.mxu0 %vm1153_vm7, %v2656_v6 }
 0x3b7   : > { %2683 = vmatmul.msk.f32.gmra.mxu2 %vm1153_vm7, %v2675_v9  ;;  %2667 = vmatmul.msk.f32.gmra.mxu1 %vm1153_vm7, %v1750_v1  ;;  %v4180_v10 = vpop.permute.xlu0 %2134  ;;  %v2235_v43 = vpop.permute.xlu2 %2234 }
 0x3b8   : > { %v4172_v16 = vpop.permute.xlu1 %2086  ;;  %v1812_v63 = vpop.f32.mrf.mxu0  ;;  %v2268_v24 = vmul.f32 %v2235_v43, %v2197_v47 }
 0x3bf   : > { %2684 = vmatmul.msk.f32.gmra.mxu2 %vm1153_vm7, %v2676_v56  ;;  %2668 = vmatmul.msk.f32.gmra.mxu1 %vm1153_vm7, %v1751_v42  ;;  %v2240_v28 = vpop.permute.xlu0 %2239  ;;  %v4186_v57 = vpop.permute.xlu2 %2249 }
 0x3c0   : > { %v2110_v20 = vpop.permute.xlu1 %2109  ;;  %v1815_v35 = vpop.f32.mrf.mxu0 }
 0x3c1   : > { %v2203_v42 = vpop.f32.mrf.mxu3 }
 0x3c7   : > { %2685 = vmatmul.msk.f32.gmra.mxu2 %vm1153_vm7, %v2677_v11  ;;  %2669 = vmatmul.msk.f32.gmra.mxu1 %vm1153_vm7, %v1752_v49  ;;  %v4184_v39 = vpop.permute.xlu0 %2254  ;;  %v4193_v29 = vpop.permute.xlu2 %2264 }
 0x3c8   : > { %v4178_v23 = vpop.permute.xlu1 %2124 }
 0x3c9   : > { %v2206_v43 = vpop.f32.mrf.mxu3 }
 0x3cf   : > { %2686 = vmatmul.msk.f32.gmra.mxu2 %vm1153_vm7, %v2678_v44  ;;  %2670 = vmatmul.msk.f32.gmra.mxu1 %vm1153_vm7, %v1753_v54  ;;  %v2287_v4 = vpop.permute.xlu0 %2286  ;;  %v2297_v44 = vpop.permute.xlu2 %2296 }
 0x3d0   : > { %v2230_v15 = vpop.permute.xlu1 %2229 }
 0x3d1   : > { %v2267_v41 = vmul.f32 %v2230_v15, %v2194_v33 }
 0x3d3   : > { %v2324_v34 = vadd.f32 %v2287_v4, %v2267_v41 }
 0x3d7   : > { %2687 = vmatmul.msk.f32.gmra.mxu2 %vm1153_vm7, %v2679_v12  ;;  %2671 = vmatmul.msk.f32.gmra.mxu1 %vm1153_vm7, %v1754_v14  ;;  %v2269_v12 = vmul.f32 %v2240_v28, %v2200_v52  ;;  %v2302_v47 = vpop.permute.xlu0 %2301 }
 0x3d8   : > { %v2245_v46 = vpop.permute.xlu1 %2244 }
 0x3df   : > { %2688 = vmatmul.msk.f32.gmra.mxu2 %vm1153_vm7, %v2680_v7  ;;  %2672 = vmatmul.msk.f32.gmra.mxu1 %vm1153_vm7, %v1755_v60  ;;  %v1818_v7 = vpop.f32.mrf.mxu0  ;;  %v2326_v60 = vadd.f32 %v2297_v44, %v2269_v12 }
 0x3e0   : > { %v4188_v27 = vpop.permute.xlu1 %2259 }
 0x3e8   : > { %v2292_v5 = vpop.permute.xlu1 %2291 }
 0x3e9   : > { %v2325_v9 = vadd.f32 %v2292_v5, %v2268_v24 }
 0x424   : > { %v1911_v45 = vpop.f32.mrf.mxu1 }
 0x425   : > { %v1912_v51 = vadd.f32 %v1911_v45, %v1806_v26 }
 0x42a   : > { %v2017_v53 = vpop.f32.mrf.mxu2 }
 0x42b   : > { %v2041_v36 = vadd.f32 %v2017_v53, %v1912_v51  ;;  %v1821_v53 = vpop.f32.mrf.mxu0 }
 0x42c   : > { %v1914_v37 = vpop.f32.mrf.mxu1 }
 0x42d   : > { %v2089_v30 = vmul.f32 %v2052_v8, %v2041_v36  ;;  %v1915_v25 = vadd.f32 %v1914_v37, %v1809_v38  ;;  %v2307_v37 = vpop.permute.xlu1 %2306 }
 0x42f   : > { %v2137_v17 = vadd.f32 %v2100_v19, %v2089_v30  ;;  %v2271_v30 = vmul.f32 %v4186_v57, %v2206_v43 }
 0x431   : > { %v2332_v55 = vadd.f32 %v2324_v34, %v2137_v17  ;;  %v2209_v34 = vpop.f32.mrf.mxu3 }
 0x432   : > { %v2020_v31 = vpop.f32.mrf.mxu2 }
 0x433   : > { %v2340_v50 = vmax.f32 %v2332_v55, 0.0  ;;  %v2042_v2 = vadd.f32 %v2020_v31, %v1915_v25  ;;  %v1824_v55 = vpop.f32.mrf.mxu0 }
 0x434   : > { %v1917_v3 = vpop.f32.mrf.mxu1 }
 0x435   : > { %2348 = vst [vmem:[%s4195_s15] sm:$0xff] %v2340_v50  ;;  %v2090_v58 = vmul.f32 %v2057_v62, %v2042_v2  ;;  %v1918_v13 = vadd.f32 %v1917_v3, %v1812_v63  ;;  %v2312_v50 = vpop.permute.xlu2 %2311  ;;  %v2272_v3 = vmul.f32 %v4184_v39, %v2209_v34 }
 0x437   : > { %v2138_v1 = vadd.f32 %v2105_v18, %v2090_v58  ;;  %v2270_v18 = vmul.f32 %v2245_v46, %v2203_v42 }
 0x439   : > { %v2333_v56 = vadd.f32 %v2325_v9, %v2138_v1  ;;  %v2327_v28 = vadd.f32 %v2302_v47, %v2270_v18 }
 0x43a   : > { %v2023_v6 = vpop.f32.mrf.mxu2 }
 0x43b   : > { %v2341_v11 = vmax.f32 %v2333_v56, 0.0  ;;  %v2043_v49 = vadd.f32 %v2023_v6, %v1918_v13  ;;  %v1827_v42 = vpop.f32.mrf.mxu0 }
 0x43c   : > { %v1920_v54 = vpop.f32.mrf.mxu1 }
 0x43d   : > { %2349 = vst [vmem:[%s4195_s15 + $0x8] sm:$0xff] %v2341_v11  ;;  %v2091_v14 = vmul.f32 %v4164_v32, %v2043_v49  ;;  %v1921_v19 = vadd.f32 %v1920_v54, %v1815_v35  ;;  %v2329_v35 = vadd.f32 %v2312_v50, %v2272_v3  ;;  %v2317_v11 = vpop.permute.xlu0 %2316 }
 0x43f   : > { %v2139_v8 = vadd.f32 %v2110_v20, %v2091_v14 }
 0x441   : > { %v2334_v62 = vadd.f32 %v2326_v60, %v2139_v8 }
 0x442   : > { %v2026_v15 = vpop.f32.mrf.mxu2 }
 0x443   : > { %v2342_v26 = vmax.f32 %v2334_v62, 0.0  ;;  %v2044_v33 = vadd.f32 %v2026_v15, %v1921_v19 }
 0x444   : > { %v1923_v38 = vpop.f32.mrf.mxu1 }
 0x445   : > { %2350 = vst [vmem:[%s4195_s15 + $0x10] sm:$0xff] %v2342_v26  ;;  %v2092_v45 = vmul.f32 %v4162_v0, %v2044_v33  ;;  %v1924_v32 = vadd.f32 %v1923_v38, %v1818_v7  ;;  %v2328_v0 = vadd.f32 %v2307_v37, %v2271_v30  ;;  %v2322_v7 = vpop.permute.xlu1 %2321 }
 0x447   : > { %v2140_v51 = vadd.f32 %v4176_v21, %v2092_v45 }
 0x449   : > { %v2335_v63 = vadd.f32 %v2327_v28, %v2140_v51 }
 0x44a   : > { %v2029_v20 = vpop.f32.mrf.mxu2 }
 0x44b   : > { %v2343_v41 = vmax.f32 %v2335_v63, 0.0  ;;  %v2045_v36 = vadd.f32 %v2029_v20, %v1924_v32 }
 0x44c   : > { %v1926_v46 = vpop.f32.mrf.mxu1 }
 0x44d   : > { %2351 = vst [vmem:[%s4195_s15 + $0x18] sm:$0xff] %v2343_v41  ;;  %v2093_v4 = vmul.f32 %v4166_v59, %v2045_v36  ;;  %v1927_v25 = vadd.f32 %v1926_v46, %v1821_v53 }
 0x44f   : > { %v2141_v17 = vadd.f32 %v4174_v22, %v2093_v4  ;;  %v2212_v22 = vpop.f32.mrf.mxu3 }
 0x450   : > { %v2273_v1 = vmul.f32 %v4188_v27, %v2212_v22 }
 0x451   : > { %v2336_v21 = vadd.f32 %v2328_v0, %v2141_v17 }
 0x452   : > { %v2032_v52 = vpop.f32.mrf.mxu2 }
 0x453   : > { %v2344_v31 = vmax.f32 %v2336_v21, 0.0  ;;  %v2046_v5 = vadd.f32 %v2032_v52, %v1927_v25 }
 0x454   : > { %v1929_v2 = vpop.f32.mrf.mxu1 }
 0x455   : > { %2352 = vst [vmem:[%s4195_s15 + $0x20] sm:$0xff] %v2344_v31  ;;  %v2094_v57 = vmul.f32 %v4170_v48, %v2046_v5  ;;  %v1930_v24 = vadd.f32 %v1929_v2, %v1824_v55  ;;  %v2330_v48 = vadd.f32 %v2317_v11, %v2273_v1 }
 0x457   : > { %v2142_v59 = vadd.f32 %v4178_v23, %v2094_v57  ;;  %v2215_v54 = vpop.f32.mrf.mxu3 }
 0x459   : > { %v2337_v58 = vadd.f32 %v2329_v35, %v2142_v59 }
 0x45a   : > { %v2035_v9 = vpop.f32.mrf.mxu2 }
 0x45b   : > { %v2345_v13 = vmax.f32 %v2337_v58, 0.0  ;;  %v2047_v56 = vadd.f32 %v2035_v9, %v1930_v24 }
 0x45c   : > { %v1932_v6 = vpop.f32.mrf.mxu1 }
 0x45d   : > { %2353 = vst [vmem:[%s4195_s15 + $0x28] sm:$0xff] %v2345_v13  ;;  %v2095_v39 = vmul.f32 %v4168_v40, %v2047_v56  ;;  %v1933_v49 = vadd.f32 %v1932_v6, %v1827_v42  ;;  %v2274_v40 = vmul.f32 %v4193_v29, %v2215_v54 }
 0x45f   : > { %v2143_v23 = vadd.f32 %v4182_v61, %v2095_v39  ;;  %v2331_v60 = vadd.f32 %v2322_v7, %v2274_v40 }
 0x461   : > { %v2338_v44 = vadd.f32 %v2330_v48, %v2143_v23 }
 0x462   : > { %v2038_v12 = vpop.f32.mrf.mxu2 }
 0x463   : > { %v2346_v27 = vmax.f32 %v2338_v44, 0.0  ;;  %v2048_v14 = vadd.f32 %v2038_v12, %v1933_v49 }
 0x465   : > { %2354 = vst [vmem:[%s4195_s15 + $0x30] sm:$0xff] %v2346_v27  ;;  %v2096_v61 = vmul.f32 %v4172_v16, %v2048_v14 }
 0x467   : > { %v2144_v8 = vadd.f32 %v4180_v10, %v2096_v61 }
 0x469   : > { %v2339_v19 = vadd.f32 %v2331_v60, %v2144_v8 }
 0x46b   : > { %v2347_v62 = vmax.f32 %v2339_v19, 0.0 }
 0x46d   : > { %2355 = vst [vmem:[%s4195_s15 + $0x38] sm:$0xff] %v2347_v62 }
 0x46e   : > { %2983 = shalt.err (!%p2980_p3)
}
 0x46f   : > { %s3028_s21 = smov 128   ;;  %s3029_s15 = smov 8  }
 0x470   : > { %2720 = dma.vmem_to_hbm [thread:$0]  (%p3108_p5), %s2370_s28, 1024, %s2372_s22, %s2357_s29, %s3028_s21, %s3028_s21, %s3029_s15  }
 0x471 PF: > { %p2726_p4 = scmp.ge.s32.totalorder %s3018_s27, 2  ;;  %s2386_s20 = sand.u32 1, %s3006_s24  }
 0x472   : > { %s2387_s16 = scalar_lea.sflag [#allocation3], %s2386_s20 }
 0x473   : > { %p2723_p7 = pnand %p2726_p4, %p3112_p6 }
 0x475   : > { %p2724_p8 = pneg %p2723_p7 }
 0x477   : > { %3001 = dma.done.wait (%p2724_p8), %s2387_s16, 1024  }
 0x478   : > { %3003 = vsyncadd (%p2724_p8), %s2387_s16, 4294966272  ;;  %p17_p9 = scmp.ge.s32.totalorder %s3095_s30, 4   ;;  %s4267_s24 = smov %s3010_s25 }
 0x479   : > { %s4268_s25 = smov %s3014_s26  ;;  %s4269_s26 = smov %s3106_s10 }
 0x47a   : > { %s4270_s27 = smov %s3095_s30  ;;  %19 = sbr.rel (!%p17_p9) target bundleno = 3 (0x3), region = 101 }
 0x47f   :  { %2393 = vsyncpa [#allocation3], 1 }
 0x480   :  { %2395 = vsyncpa [#allocation3 + $0x1], 1 }

</bundles_post_ra>
